<compile_context>
chip_gen: v7x
topology: tpu7x:2x2x1
jax: 0.10.0
libtpu: 0.0.40
codegen_flags: <defaults>
</compile_context>

<pallas_src>
import functools

import numpy as np
import jax
import jax.numpy as jnp
from jax import lax
from jax.experimental import pallas as pl
from jax.experimental.pallas import tpu as pltpu


# ----------------------------------- kernel -----------------------------------

def _conv3x3_flat(pad_ref, w_ref, cin, d, Wp, P, off0):
    """Dilated 3x3 conv, channels-first, over the flat zero-padded buffer.

    pad_ref : (Cmax, L) bf16 scratch; padded pixel (r, c) lives at lane
              (off0 - dmax*Wp) + r*Wp + c.
    w_ref   : (9, Cout, cin) bf16 with tap index k = ky*3 + kx.
    Returns (Cout, P) f32 where column q = y*Wp + dmax + x is output pixel
    (y, x); out-of-image columns are junk and are masked / sliced off later.
    Every tap is a contiguous lane-slice (no im2col copy); nine bf16 MXU
    matmuls accumulate in f32.
    """
    acc = None
    for ky in range(3):
        for kx in range(3):
            base = off0 + (ky - 1) * d * Wp + (kx - 1) * d
            win = pad_ref[0:cin, base:base + P]                       # (cin, P) bf16
            wk = w_ref[ky * 3 + kx]                                   # (Cout, cin) bf16
            part = jnp.dot(wk, win, preferred_element_type=jnp.float32)
            acc = part if acc is None else acc + part
    return acc


def _basic_block_kernel(x_ref, w1_ref, s1_ref, b1_ref, w2_ref, s2_ref, b2_ref,
                        mask_ref, o_ref, pad_ref, *,
                        Cin, planes, d1, d2, Wp, P, off0, residual):
    Cmax, L = pad_ref.shape
    botz = off0 + P

    # Zero front guard + top halo rows and bottom halo rows + tail guard every
    # grid step (megacore-safe; the interior [off0, botz) is rewritten below).
    pad_ref[:, 0:off0] = jnp.zeros((Cmax, off0), pad_ref.dtype)
    pad_ref[:, botz:L] = jnp.zeros((Cmax, L - botz), pad_ref.dtype)

    # ---- conv1 (3x3, dilation d1, padding d1) + bn1 + relu ----
    # x rows arrive already zero-padded in width -> side halos are free.
    pad_ref[0:Cin, off0:botz] = x_ref[0].astype(pad_ref.dtype)
    h = _conv3x3_flat(pad_ref, w1_ref, Cin, d1, Wp, P, off0)          # (planes, P) f32
    h = jnp.maximum(h * s1_ref[...] + b1_ref[...], 0.0)
    # Zero out-of-image columns so they become the zero side-halo for conv2.
    h = jnp.where(mask_ref[...] > 0.5, h, 0.0)

    # ---- conv2 (3x3, dilation d2, padding d2) + bn2 ----
    pad_ref[0:planes, off0:botz] = h.astype(pad_ref.dtype)
    h = _conv3x3_flat(pad_ref, w2_ref, planes, d2, Wp, P, off0)
    h = h * s2_ref[...] + b2_ref[...]

    # ---- residual add + relu (junk columns are sliced off by the wrapper) ----
    if residual:
        h = h + x_ref[0]                   # re-read x; keeps vreg pressure low
    o_ref[...] = jnp.maximum(h, 0.0)[None].astype(o_ref.dtype)


# ----------------------------------- wrapper -----------------------------------

def basic_block_pallas(x_nchw, params, *, dilation=(1, 1), stride=1, residual=True):
    """PyTorch-style NCHW in / NCHW out.  BN in eval mode (folded scale/bias)."""
    # TODO(synk): stride > 1 / downsample branch not implemented.
    assert stride == 1, "stride > 1 not implemented"
    w1, s1, b1, w2, s2, b2 = params           # w: (9, Cout, Cin) bf16, s/b: (Cout, 1) f32
    N, Cin, H, W = x_nchw.shape
    planes = w1.shape[1]
    d1, d2 = dilation
    assert d1 >= 1 and d2 >= 1
    if residual:
        assert Cin == planes, "residual add with downsample=None needs inplanes == planes"
    dmax = max(d1, d2)
    Cmax = max(Cin, planes)

    # Padded row width (>= W + 2*dmax); round up cheaply so P = H*Wp is a
    # multiple of 128 -> fully lane-dense loads/stores.
    Wp = W + 2 * dmax
    for cand in range(Wp, Wp + 16):
        if (H * cand) % 128 == 0:
            Wp = cand
            break
    P = H * Wp
    off0 = ((dmax + dmax * Wp + 127) // 128) * 128      # 128-aligned interior start
    L = off0 + P + dmax * Wp + dmax                     # flat scratch length incl. guards

    # Width-pad x once in the wrapper (cheap contiguous copy, no transposes);
    # kernel input/output stay NCHW-flat.
    xp = jnp.pad(x_nchw.astype(jnp.float32),
                 ((0, 0), (0, 0), (0, 0), (dmax, Wp - W - dmax)))
    x_flat = xp.reshape(N, Cin, P)

    # 0/1 mask of in-image columns in flat padded-row coordinates.
    col = np.arange(P, dtype=np.int64) % Wp
    mask = jnp.asarray(((col >= dmax) & (col < dmax + W))
                       .astype(np.float32).reshape(1, P))

    kernel = functools.partial(_basic_block_kernel, Cin=Cin, planes=planes,
                               d1=d1, d2=d2, Wp=Wp, P=P, off0=off0,
                               residual=residual)

    grid_spec = pltpu.PrefetchScalarGridSpec(
        num_scalar_prefetch=0,
        grid=(N,),
        in_specs=[
            pl.BlockSpec((1, Cin, P), lambda n: (n, 0, 0)),          # x (width-padded rows)
            pl.BlockSpec((9, planes, Cin), lambda n: (0, 0, 0)),     # w1 (tap, cout, cin) bf16
            pl.BlockSpec((planes, 1), lambda n: (0, 0)),             # bn1 scale
            pl.BlockSpec((planes, 1), lambda n: (0, 0)),             # bn1 bias
            pl.BlockSpec((9, planes, planes), lambda n: (0, 0, 0)),  # w2
            pl.BlockSpec((planes, 1), lambda n: (0, 0)),             # bn2 scale
            pl.BlockSpec((planes, 1), lambda n: (0, 0)),             # bn2 bias
            pl.BlockSpec((1, P), lambda n: (0, 0)),                  # in-image column mask
        ],
        out_specs=pl.BlockSpec((1, planes, P), lambda n: (n, 0, 0)),
        scratch_shapes=[
            pltpu.VMEM((Cmax, L), jnp.bfloat16),   # single shared zero-padded image buffer
        ],
    )

    # Honest per-step VMEM footprint (double-buffered blocks + scratch + f32 work).
    blk = 2 * (Cin * P * 4 + planes * P * 4)
    wgt = 2 * (9 * planes * (Cin + planes) * 2 + 4 * planes * 4 + P * 4)
    scratch = Cmax * L * 2
    work = 4 * planes * P * 4
    footprint = blk + wgt + scratch + work
    try:
        vmem_cap = pltpu.get_tpu_info().vmem_capacity_bytes
    except Exception:                       # conservative (v7x-sized) fallback
        vmem_cap = 64 * 1024 * 1024
    vmem_limit = int(min(0.75 * vmem_cap, max(2 * footprint, 16 * 1024 * 1024)))

    flops = 2 * N * P * 9 * (Cin * planes + planes * planes)
    bytes_accessed = (N * (Cin + planes) * P * 4
                      + 9 * planes * (Cin + planes) * 2
                      + 4 * planes * 4 + P * 4)

    out_flat = pl.pallas_call(
        kernel,
        out_shape=jax.ShapeDtypeStruct((N, planes, P), jnp.float32),
        grid_spec=grid_spec,
        compiler_params=pltpu.CompilerParams(
            dimension_semantics=("parallel",),
            vmem_limit_bytes=vmem_limit),
        cost_estimate=pl.CostEstimate(flops=flops, transcendentals=0,
                                      bytes_accessed=bytes_accessed),
    )(x_flat, w1, s1, b1, w2, s2, b2, mask)

    # Strip the width padding: (N, planes, H, Wp) -> (N, planes, H, W).
    return out_flat.reshape(N, planes, H, Wp)[:, :, :, dmax:dmax + W]


# ----------------------------- parameters & reference -----------------------------

def _fold_bn(gamma, beta, mean, var, eps=1e-5):
    scale = gamma / jnp.sqrt(var + eps)
    bias = beta - mean * scale
    return (scale.reshape(-1, 1).astype(jnp.float32),
            bias.reshape(-1, 1).astype(jnp.float32))


def make_params(key, inplanes, planes):
    """Synthetic BasicBlock parameters in kernel-friendly layouts."""
    ks = jax.random.split(key, 4)
    w1_oihw = jax.random.normal(ks[0], (planes, inplanes, 3, 3), jnp.float32) * 0.1
    w2_oihw = jax.random.normal(ks[1], (planes, planes, 3, 3), jnp.float32) * 0.1

    def bn(k, c):
        kg, kb, km, kv = jax.random.split(k, 4)
        gamma = 1.0 + 0.1 * jax.random.normal(kg, (c,), jnp.float32)
        beta = 0.1 * jax.random.normal(kb, (c,), jnp.float32)
        mean = 0.1 * jax.random.normal(km, (c,), jnp.float32)
        var = jnp.abs(jax.random.normal(kv, (c,), jnp.float32)) + 0.5
        return gamma, beta, mean, var

    s1, b1 = _fold_bn(*bn(ks[2], planes))
    s2, b2 = _fold_bn(*bn(ks[3], planes))

    def to_tap_layout(w_oihw):        # (O, I, 3, 3) -> (9, O, I), k = ky*3 + kx, bf16
        o, i = w_oihw.shape[0], w_oihw.shape[1]
        return jnp.transpose(w_oihw, (2, 3, 0, 1)).reshape(9, o, i).astype(jnp.bfloat16)

    return (to_tap_layout(w1_oihw), s1, b1, to_tap_layout(w2_oihw), s2, b2)


def reference_basic_block(x_nchw, params, *, dilation=(1, 1), residual=True):
    """Pure-JAX NCHW reference with the same bf16-operand / f32-accumulate numerics."""
    w1, s1, b1, w2, s2, b2 = params
    d1, d2 = dilation

    def conv(h, w_tap, d):
        cout, cin = w_tap.shape[1], w_tap.shape[2]
        w_oihw = jnp.transpose(w_tap, (1, 2, 0)).reshape(cout, cin, 3, 3)
        return lax.conv_general_dilated(
            h.astype(jnp.bfloat16), w_oihw, window_strides=(1, 1),
            padding=[(d, d), (d, d)], rhs_dilation=(d, d),
            dimension_numbers=("NCHW", "OIHW", "NCHW"),
            preferred_element_type=jnp.float32)

    x = x_nchw.astype(jnp.float32)
    h = jnp.maximum(conv(x, w1, d1) * s1[None, :, :, None] + b1[None, :, :, None], 0.0)
    h = conv(h, w2, d2) * s2[None, :, :, None] + b2[None, :, :, None]
    if residual:
        h = h + x
    return jnp.maximum(h, 0.0)


if __name__ == "__main__":
    # BasicBlock default config: stride=1, downsample=None => inplanes == planes.
    N, planes = 2, 32
    inplanes = planes
    H = W = 16
    dilation = (1, 2)                 # exercise the dilated path

    key = jax.random.PRNGKey(0)
    kx_, kp = jax.random.split(key)
    x_nchw = jax.random.normal(kx_, (N, inplanes, H, W), jnp.float32)   # PyTorch NCHW
    params = make_params(kp, inplanes, planes)

    out = basic_block_pallas(x_nchw, params, dilation=dilation, residual=True)
    out = jax.block_until_ready(out)

    ref = jax.block_until_ready(
        reference_basic_block(x_nchw, params, dilation=dilation, residual=True))
    np.testing.assert_allclose(np.asarray(out), np.asarray(ref), rtol=2e-3, atol=2e-3)

    print("KERNEL_OK")
</pallas_src>

<mosaic_0001>
module attributes {stable_mosaic.version = 11 : i64} {
  func.func @_basic_block_kernel(%arg0: i32, %arg1: memref<1x32x384xf32, #tpu.memory_space<vmem>>, %arg2: memref<9x32x32xbf16, #tpu.memory_space<vmem>>, %arg3: memref<32x1xf32, #tpu.memory_space<vmem>>, %arg4: memref<32x1xf32, #tpu.memory_space<vmem>>, %arg5: memref<9x32x32xbf16, #tpu.memory_space<vmem>>, %arg6: memref<32x1xf32, #tpu.memory_space<vmem>>, %arg7: memref<32x1xf32, #tpu.memory_space<vmem>>, %arg8: memref<1x384xf32, #tpu.memory_space<vmem>>, %arg9: memref<1x32x384xf32, #tpu.memory_space<vmem>>, %arg10: memref<32x562xbf16, #tpu.memory_space<vmem>>) attributes {dimension_semantics = [#tpu.dimension_semantics<parallel>], iteration_bounds = array<i64: 2>, scalar_prefetch = 0 : i64, scratch_operands = 1 : i64, tpu.core_type = #tpu.core_type<tc>, window_params = [{transform_indices = @transform_0, window_bounds = array<i64: 1, 32, 384>}, {pipeline_mode = #tpu.pipeline_mode<synchronous>, transform_indices = @transform_1, window_bounds = array<i64: 9, 32, 32>}, {pipeline_mode = #tpu.pipeline_mode<synchronous>, transform_indices = @transform_2, window_bounds = array<i64: 32, 1>}, {pipeline_mode = #tpu.pipeline_mode<synchronous>, transform_indices = @transform_3, window_bounds = array<i64: 32, 1>}, {pipeline_mode = #tpu.pipeline_mode<synchronous>, transform_indices = @transform_4, window_bounds = array<i64: 9, 32, 32>}, {pipeline_mode = #tpu.pipeline_mode<synchronous>, transform_indices = @transform_5, window_bounds = array<i64: 32, 1>}, {pipeline_mode = #tpu.pipeline_mode<synchronous>, transform_indices = @transform_6, window_bounds = array<i64: 32, 1>}, {pipeline_mode = #tpu.pipeline_mode<synchronous>, transform_indices = @transform_7, window_bounds = array<i64: 1, 384>}, {transform_indices = @transform_8, window_bounds = array<i64: 1, 32, 384>}]} {
    %cst = arith.constant 0.000000e+00 : bf16
    %0 = vector.broadcast %cst : bf16 to vector<32x128xbf16>
    %c0 = arith.constant 0 : index
    %c0_0 = arith.constant 0 : index
    %1 = vector.load %arg10[%c0, %c0_0] : memref<32x562xbf16, #tpu.memory_space<vmem>>, vector<32x128xbf16>
    tpu.vector_store %arg10[%c0, %c0_0], %0 {strides = array<i32>} : memref<32x562xbf16, #tpu.memory_space<vmem>>, vector<32x128xbf16>,
    %cst_1 = arith.constant 0.000000e+00 : bf16
    %2 = vector.broadcast %cst_1 : bf16 to vector<32x50xbf16>
    %c0_2 = arith.constant 0 : index
    %c512 = arith.constant 512 : index
    %3 = vector.load %arg10[%c0_2, %c512] : memref<32x562xbf16, #tpu.memory_space<vmem>>, vector<32x50xbf16>
    tpu.vector_store %arg10[%c0_2, %c512], %2 {strides = array<i32>} : memref<32x562xbf16, #tpu.memory_space<vmem>>, vector<32x50xbf16>,
    %c0_3 = arith.constant 0 : index
    %c0_4 = arith.constant 0 : index
    %c0_5 = arith.constant 0 : index
    %4 = vector.load %arg1[%c0_3, %c0_4, %c0_5] : memref<1x32x384xf32, #tpu.memory_space<vmem>>, vector<1x32x384xf32>
    %5 = vector.shape_cast %4 : vector<1x32x384xf32> to vector<32x384xf32>
    %6 = arith.truncf %5 : vector<32x384xf32> to vector<32x384xbf16>
    %c0_6 = arith.constant 0 : index
    %c128 = arith.constant 128 : index
    %7 = vector.load %arg10[%c0_6, %c128] : memref<32x562xbf16, #tpu.memory_space<vmem>>, vector<32x384xbf16>
    tpu.vector_store %arg10[%c0_6, %c128], %6 {strides = array<i32>} : memref<32x562xbf16, #tpu.memory_space<vmem>>, vector<32x384xbf16>,
    %c0_7 = arith.constant 0 : index
    %c103 = arith.constant 103 : index
    %8 = vector.load %arg10[%c0_7, %c103] : memref<32x562xbf16, #tpu.memory_space<vmem>>, vector<32x384xbf16>
    %c0_8 = arith.constant 0 : index
    %c0_9 = arith.constant 0 : index
    %c0_10 = arith.constant 0 : index
    %9 = vector.load %arg2[%c0_8, %c0_9, %c0_10] : memref<9x32x32xbf16, #tpu.memory_space<vmem>>, vector<1x32x32xbf16>
    %10 = vector.shape_cast %9 : vector<1x32x32xbf16> to vector<32x32xbf16>
    %cst_11 = arith.constant dense<0.000000e+00> : vector<32x384xf32>
    %11 = tpu.matmul %10, %8, %cst_11 {dimension_numbers = #tpu.dot_dimension_numbers<[1], [0], [0], [1], [0, 0, 1, 1], [], []>} : vector<32x32xbf16>, vector<32x384xbf16>, vector<32x384xf32> -> vector<32x384xf32>
    %c0_12 = arith.constant 0 : index
    %c104 = arith.constant 104 : index
    %12 = vector.load %arg10[%c0_12, %c104] : memref<32x562xbf16, #tpu.memory_space<vmem>>, vector<32x384xbf16>
    %c1 = arith.constant 1 : index
    %c0_13 = arith.constant 0 : index
    %c0_14 = arith.constant 0 : index
    %13 = vector.load %arg2[%c1, %c0_13, %c0_14] : memref<9x32x32xbf16, #tpu.memory_space<vmem>>, vector<1x32x32xbf16>
    %14 = vector.shape_cast %13 : vector<1x32x32xbf16> to vector<32x32xbf16>
    %cst_15 = arith.constant dense<0.000000e+00> : vector<32x384xf32>
    %15 = tpu.matmul %14, %12, %cst_15 {dimension_numbers = #tpu.dot_dimension_numbers<[1], [0], [0], [1], [0, 0, 1, 1], [], []>} : vector<32x32xbf16>, vector<32x384xbf16>, vector<32x384xf32> -> vector<32x384xf32>
    %16 = arith.addf %11, %15 : vector<32x384xf32>
    %c0_16 = arith.constant 0 : index
    %c105 = arith.constant 105 : index
    %17 = vector.load %arg10[%c0_16, %c105] : memref<32x562xbf16, #tpu.memory_space<vmem>>, vector<32x384xbf16>
    %c2 = arith.constant 2 : index
    %c0_17 = arith.constant 0 : index
    %c0_18 = arith.constant 0 : index
    %18 = vector.load %arg2[%c2, %c0_17, %c0_18] : memref<9x32x32xbf16, #tpu.memory_space<vmem>>, vector<1x32x32xbf16>
    %19 = vector.shape_cast %18 : vector<1x32x32xbf16> to vector<32x32xbf16>
    %cst_19 = arith.constant dense<0.000000e+00> : vector<32x384xf32>
    %20 = tpu.matmul %19, %17, %cst_19 {dimension_numbers = #tpu.dot_dimension_numbers<[1], [0], [0], [1], [0, 0, 1, 1], [], []>} : vector<32x32xbf16>, vector<32x384xbf16>, vector<32x384xf32> -> vector<32x384xf32>
    %21 = arith.addf %16, %20 : vector<32x384xf32>
    %c0_20 = arith.constant 0 : index
    %c127 = arith.constant 127 : index
    %22 = vector.load %arg10[%c0_20, %c127] : memref<32x562xbf16, #tpu.memory_space<vmem>>, vector<32x384xbf16>
    %c3 = arith.constant 3 : index
    %c0_21 = arith.constant 0 : index
    %c0_22 = arith.constant 0 : index
    %23 = vector.load %arg2[%c3, %c0_21, %c0_22] : memref<9x32x32xbf16, #tpu.memory_space<vmem>>, vector<1x32x32xbf16>
    %24 = vector.shape_cast %23 : vector<1x32x32xbf16> to vector<32x32xbf16>
    %cst_23 = arith.constant dense<0.000000e+00> : vector<32x384xf32>
    %25 = tpu.matmul %24, %22, %cst_23 {dimension_numbers = #tpu.dot_dimension_numbers<[1], [0], [0], [1], [0, 0, 1, 1], [], []>} : vector<32x32xbf16>, vector<32x384xbf16>, vector<32x384xf32> -> vector<32x384xf32>
    %26 = arith.addf %21, %25 : vector<32x384xf32>
    %c0_24 = arith.constant 0 : index
    %c128_25 = arith.constant 128 : index
    %27 = vector.load %arg10[%c0_24, %c128_25] : memref<32x562xbf16, #tpu.memory_space<vmem>>, vector<32x384xbf16>
    %c4 = arith.constant 4 : index
    %c0_26 = arith.constant 0 : index
    %c0_27 = arith.constant 0 : index
    %28 = vector.load %arg2[%c4, %c0_26, %c0_27] : memref<9x32x32xbf16, #tpu.memory_space<vmem>>, vector<1x32x32xbf16>
    %29 = vector.shape_cast %28 : vector<1x32x32xbf16> to vector<32x32xbf16>
    %cst_28 = arith.constant dense<0.000000e+00> : vector<32x384xf32>
    %30 = tpu.matmul %29, %27, %cst_28 {dimension_numbers = #tpu.dot_dimension_numbers<[1], [0], [0], [1], [0, 0, 1, 1], [], []>} : vector<32x32xbf16>, vector<32x384xbf16>, vector<32x384xf32> -> vector<32x384xf32>
    %31 = arith.addf %26, %30 : vector<32x384xf32>
    %c0_29 = arith.constant 0 : index
    %c129 = arith.constant 129 : index
    %32 = vector.load %arg10[%c0_29, %c129] : memref<32x562xbf16, #tpu.memory_space<vmem>>, vector<32x384xbf16>
    %c5 = arith.constant 5 : index
    %c0_30 = arith.constant 0 : index
    %c0_31 = arith.constant 0 : index
    %33 = vector.load %arg2[%c5, %c0_30, %c0_31] : memref<9x32x32xbf16, #tpu.memory_space<vmem>>, vector<1x32x32xbf16>
    %34 = vector.shape_cast %33 : vector<1x32x32xbf16> to vector<32x32xbf16>
    %cst_32 = arith.constant dense<0.000000e+00> : vector<32x384xf32>
    %35 = tpu.matmul %34, %32, %cst_32 {dimension_numbers = #tpu.dot_dimension_numbers<[1], [0], [0], [1], [0, 0, 1, 1], [], []>} : vector<32x32xbf16>, vector<32x384xbf16>, vector<32x384xf32> -> vector<32x384xf32>
    %36 = arith.addf %31, %35 : vector<32x384xf32>
    %c0_33 = arith.constant 0 : index
    %c151 = arith.constant 151 : index
    %37 = vector.load %arg10[%c0_33, %c151] : memref<32x562xbf16, #tpu.memory_space<vmem>>, vector<32x384xbf16>
    %c6 = arith.constant 6 : index
    %c0_34 = arith.constant 0 : index
    %c0_35 = arith.constant 0 : index
    %38 = vector.load %arg2[%c6, %c0_34, %c0_35] : memref<9x32x32xbf16, #tpu.memory_space<vmem>>, vector<1x32x32xbf16>
    %39 = vector.shape_cast %38 : vector<1x32x32xbf16> to vector<32x32xbf16>
    %cst_36 = arith.constant dense<0.000000e+00> : vector<32x384xf32>
    %40 = tpu.matmul %39, %37, %cst_36 {dimension_numbers = #tpu.dot_dimension_numbers<[1], [0], [0], [1], [0, 0, 1, 1], [], []>} : vector<32x32xbf16>, vector<32x384xbf16>, vector<32x384xf32> -> vector<32x384xf32>
    %41 = arith.addf %36, %40 : vector<32x384xf32>
    %c0_37 = arith.constant 0 : index
    %c152 = arith.constant 152 : index
    %42 = vector.load %arg10[%c0_37, %c152] : memref<32x562xbf16, #tpu.memory_space<vmem>>, vector<32x384xbf16>
    %c7 = arith.constant 7 : index
    %c0_38 = arith.constant 0 : index
    %c0_39 = arith.constant 0 : index
    %43 = vector.load %arg2[%c7, %c0_38, %c0_39] : memref<9x32x32xbf16, #tpu.memory_space<vmem>>, vector<1x32x32xbf16>
    %44 = vector.shape_cast %43 : vector<1x32x32xbf16> to vector<32x32xbf16>
    %cst_40 = arith.constant dense<0.000000e+00> : vector<32x384xf32>
    %45 = tpu.matmul %44, %42, %cst_40 {dimension_numbers = #tpu.dot_dimension_numbers<[1], [0], [0], [1], [0, 0, 1, 1], [], []>} : vector<32x32xbf16>, vector<32x384xbf16>, vector<32x384xf32> -> vector<32x384xf32>
    %46 = arith.addf %41, %45 : vector<32x384xf32>
    %c0_41 = arith.constant 0 : index
    %c153 = arith.constant 153 : index
    %47 = vector.load %arg10[%c0_41, %c153] : memref<32x562xbf16, #tpu.memory_space<vmem>>, vector<32x384xbf16>
    %c8 = arith.constant 8 : index
    %c0_42 = arith.constant 0 : index
    %c0_43 = arith.constant 0 : index
    %48 = vector.load %arg2[%c8, %c0_42, %c0_43] : memref<9x32x32xbf16, #tpu.memory_space<vmem>>, vector<1x32x32xbf16>
    %49 = vector.shape_cast %48 : vector<1x32x32xbf16> to vector<32x32xbf16>
    %cst_44 = arith.constant dense<0.000000e+00> : vector<32x384xf32>
    %50 = tpu.matmul %49, %47, %cst_44 {dimension_numbers = #tpu.dot_dimension_numbers<[1], [0], [0], [1], [0, 0, 1, 1], [], []>} : vector<32x32xbf16>, vector<32x384xbf16>, vector<32x384xf32> -> vector<32x384xf32>
    %51 = arith.addf %46, %50 : vector<32x384xf32>
    %c0_45 = arith.constant 0 : index
    %c0_46 = arith.constant 0 : index
    %52 = vector.load %arg3[%c0_45, %c0_46] : memref<32x1xf32, #tpu.memory_space<vmem>>, vector<32x1xf32>
    %53 = vector.broadcast %52 : vector<32x1xf32> to vector<32x384xf32>
    %54 = arith.mulf %51, %53 : vector<32x384xf32>
    %c0_47 = arith.constant 0 : index
    %c0_48 = arith.constant 0 : index
    %55 = vector.load %arg4[%c0_47, %c0_48] : memref<32x1xf32, #tpu.memory_space<vmem>>, vector<32x1xf32>
    %56 = vector.broadcast %55 : vector<32x1xf32> to vector<32x384xf32>
    %57 = arith.addf %54, %56 : vector<32x384xf32>
    %cst_49 = arith.constant 0.000000e+00 : f32
    %58 = vector.broadcast %cst_49 : f32 to vector<32x384xf32>
    %59 = arith.maximumf %57, %58 : vector<32x384xf32>
    %c0_50 = arith.constant 0 : index
    %c0_51 = arith.constant 0 : index
    %60 = vector.load %arg8[%c0_50, %c0_51] : memref<1x384xf32, #tpu.memory_space<vmem>>, vector<1x384xf32>
    %cst_52 = arith.constant 5.000000e-01 : f32
    %61 = vector.broadcast %cst_52 : f32 to vector<1x384xf32>
    %62 = arith.cmpf ogt, %60, %61 : vector<1x384xf32>
    %cst_53 = arith.constant 0.000000e+00 : f32
    %63 = vector.shape_cast %62 : vector<1x384xi1> to vector<1x384xi1>
    %64 = vector.broadcast %63 : vector<1x384xi1> to vector<32x384xi1>
    %65 = vector.broadcast %cst_53 : f32 to vector<32x384xf32>
    %66 = arith.select %64, %59, %65 : vector<32x384xi1>, vector<32x384xf32>
    %67 = arith.truncf %66 : vector<32x384xf32> to vector<32x384xbf16>
    %c0_54 = arith.constant 0 : index
    %c128_55 = arith.constant 128 : index
    %68 = vector.load %arg10[%c0_54, %c128_55] : memref<32x562xbf16, #tpu.memory_space<vmem>>, vector<32x384xbf16>
    tpu.vector_store %arg10[%c0_54, %c128_55], %67 {strides = array<i32>} : memref<32x562xbf16, #tpu.memory_space<vmem>>, vector<32x384xbf16>,
    %c0_56 = arith.constant 0 : index
    %c78 = arith.constant 78 : index
    %69 = vector.load %arg10[%c0_56, %c78] : memref<32x562xbf16, #tpu.memory_space<vmem>>, vector<32x384xbf16>
    %c0_57 = arith.constant 0 : index
    %c0_58 = arith.constant 0 : index
    %c0_59 = arith.constant 0 : index
    %70 = vector.load %arg5[%c0_57, %c0_58, %c0_59] : memref<9x32x32xbf16, #tpu.memory_space<vmem>>, vector<1x32x32xbf16>
    %71 = vector.shape_cast %70 : vector<1x32x32xbf16> to vector<32x32xbf16>
    %cst_60 = arith.constant dense<0.000000e+00> : vector<32x384xf32>
    %72 = tpu.matmul %71, %69, %cst_60 {dimension_numbers = #tpu.dot_dimension_numbers<[1], [0], [0], [1], [0, 0, 1, 1], [], []>} : vector<32x32xbf16>, vector<32x384xbf16>, vector<32x384xf32> -> vector<32x384xf32>
    %c0_61 = arith.constant 0 : index
    %c80 = arith.constant 80 : index
    %73 = vector.load %arg10[%c0_61, %c80] : memref<32x562xbf16, #tpu.memory_space<vmem>>, vector<32x384xbf16>
    %c1_62 = arith.constant 1 : index
    %c0_63 = arith.constant 0 : index
    %c0_64 = arith.constant 0 : index
    %74 = vector.load %arg5[%c1_62, %c0_63, %c0_64] : memref<9x32x32xbf16, #tpu.memory_space<vmem>>, vector<1x32x32xbf16>
    %75 = vector.shape_cast %74 : vector<1x32x32xbf16> to vector<32x32xbf16>
    %cst_65 = arith.constant dense<0.000000e+00> : vector<32x384xf32>
    %76 = tpu.matmul %75, %73, %cst_65 {dimension_numbers = #tpu.dot_dimension_numbers<[1], [0], [0], [1], [0, 0, 1, 1], [], []>} : vector<32x32xbf16>, vector<32x384xbf16>, vector<32x384xf32> -> vector<32x384xf32>
    %77 = arith.addf %72, %76 : vector<32x384xf32>
    %c0_66 = arith.constant 0 : index
    %c82 = arith.constant 82 : index
    %78 = vector.load %arg10[%c0_66, %c82] : memref<32x562xbf16, #tpu.memory_space<vmem>>, vector<32x384xbf16>
    %c2_67 = arith.constant 2 : index
    %c0_68 = arith.constant 0 : index
    %c0_69 = arith.constant 0 : index
    %79 = vector.load %arg5[%c2_67, %c0_68, %c0_69] : memref<9x32x32xbf16, #tpu.memory_space<vmem>>, vector<1x32x32xbf16>
    %80 = vector.shape_cast %79 : vector<1x32x32xbf16> to vector<32x32xbf16>
    %cst_70 = arith.constant dense<0.000000e+00> : vector<32x384xf32>
    %81 = tpu.matmul %80, %78, %cst_70 {dimension_numbers = #tpu.dot_dimension_numbers<[1], [0], [0], [1], [0, 0, 1, 1], [], []>} : vector<32x32xbf16>, vector<32x384xbf16>, vector<32x384xf32> -> vector<32x384xf32>
    %82 = arith.addf %77, %81 : vector<32x384xf32>
    %c0_71 = arith.constant 0 : index
    %c126 = arith.constant 126 : index
    %83 = vector.load %arg10[%c0_71, %c126] : memref<32x562xbf16, #tpu.memory_space<vmem>>, vector<32x384xbf16>
    %c3_72 = arith.constant 3 : index
    %c0_73 = arith.constant 0 : index
    %c0_74 = arith.constant 0 : index
    %84 = vector.load %arg5[%c3_72, %c0_73, %c0_74] : memref<9x32x32xbf16, #tpu.memory_space<vmem>>, vector<1x32x32xbf16>
    %85 = vector.shape_cast %84 : vector<1x32x32xbf16> to vector<32x32xbf16>
    %cst_75 = arith.constant dense<0.000000e+00> : vector<32x384xf32>
    %86 = tpu.matmul %85, %83, %cst_75 {dimension_numbers = #tpu.dot_dimension_numbers<[1], [0], [0], [1], [0, 0, 1, 1], [], []>} : vector<32x32xbf16>, vector<32x384xbf16>, vector<32x384xf32> -> vector<32x384xf32>
    %87 = arith.addf %82, %86 : vector<32x384xf32>
    %c0_76 = arith.constant 0 : index
    %c128_77 = arith.constant 128 : index
    %88 = vector.load %arg10[%c0_76, %c128_77] : memref<32x562xbf16, #tpu.memory_space<vmem>>, vector<32x384xbf16>
    %c4_78 = arith.constant 4 : index
    %c0_79 = arith.constant 0 : index
    %c0_80 = arith.constant 0 : index
    %89 = vector.load %arg5[%c4_78, %c0_79, %c0_80] : memref<9x32x32xbf16, #tpu.memory_space<vmem>>, vector<1x32x32xbf16>
    %90 = vector.shape_cast %89 : vector<1x32x32xbf16> to vector<32x32xbf16>
    %cst_81 = arith.constant dense<0.000000e+00> : vector<32x384xf32>
    %91 = tpu.matmul %90, %88, %cst_81 {dimension_numbers = #tpu.dot_dimension_numbers<[1], [0], [0], [1], [0, 0, 1, 1], [], []>} : vector<32x32xbf16>, vector<32x384xbf16>, vector<32x384xf32> -> vector<32x384xf32>
    %92 = arith.addf %87, %91 : vector<32x384xf32>
    %c0_82 = arith.constant 0 : index
    %c130 = arith.constant 130 : index
    %93 = vector.load %arg10[%c0_82, %c130] : memref<32x562xbf16, #tpu.memory_space<vmem>>, vector<32x384xbf16>
    %c5_83 = arith.constant 5 : index
    %c0_84 = arith.constant 0 : index
    %c0_85 = arith.constant 0 : index
    %94 = vector.load %arg5[%c5_83, %c0_84, %c0_85] : memref<9x32x32xbf16, #tpu.memory_space<vmem>>, vector<1x32x32xbf16>
    %95 = vector.shape_cast %94 : vector<1x32x32xbf16> to vector<32x32xbf16>
    %cst_86 = arith.constant dense<0.000000e+00> : vector<32x384xf32>
    %96 = tpu.matmul %95, %93, %cst_86 {dimension_numbers = #tpu.dot_dimension_numbers<[1], [0], [0], [1], [0, 0, 1, 1], [], []>} : vector<32x32xbf16>, vector<32x384xbf16>, vector<32x384xf32> -> vector<32x384xf32>
    %97 = arith.addf %92, %96 : vector<32x384xf32>
    %c0_87 = arith.constant 0 : index
    %c174 = arith.constant 174 : index
    %98 = vector.load %arg10[%c0_87, %c174] : memref<32x562xbf16, #tpu.memory_space<vmem>>, vector<32x384xbf16>
    %c6_88 = arith.constant 6 : index
    %c0_89 = arith.constant 0 : index
    %c0_90 = arith.constant 0 : index
    %99 = vector.load %arg5[%c6_88, %c0_89, %c0_90] : memref<9x32x32xbf16, #tpu.memory_space<vmem>>, vector<1x32x32xbf16>
    %100 = vector.shape_cast %99 : vector<1x32x32xbf16> to vector<32x32xbf16>
    %cst_91 = arith.constant dense<0.000000e+00> : vector<32x384xf32>
    %101 = tpu.matmul %100, %98, %cst_91 {dimension_numbers = #tpu.dot_dimension_numbers<[1], [0], [0], [1], [0, 0, 1, 1], [], []>} : vector<32x32xbf16>, vector<32x384xbf16>, vector<32x384xf32> -> vector<32x384xf32>
    %102 = arith.addf %97, %101 : vector<32x384xf32>
    %c0_92 = arith.constant 0 : index
    %c176 = arith.constant 176 : index
    %103 = vector.load %arg10[%c0_92, %c176] : memref<32x562xbf16, #tpu.memory_space<vmem>>, vector<32x384xbf16>
    %c7_93 = arith.constant 7 : index
    %c0_94 = arith.constant 0 : index
    %c0_95 = arith.constant 0 : index
    %104 = vector.load %arg5[%c7_93, %c0_94, %c0_95] : memref<9x32x32xbf16, #tpu.memory_space<vmem>>, vector<1x32x32xbf16>
    %105 = vector.shape_cast %104 : vector<1x32x32xbf16> to vector<32x32xbf16>
    %cst_96 = arith.constant dense<0.000000e+00> : vector<32x384xf32>
    %106 = tpu.matmul %105, %103, %cst_96 {dimension_numbers = #tpu.dot_dimension_numbers<[1], [0], [0], [1], [0, 0, 1, 1], [], []>} : vector<32x32xbf16>, vector<32x384xbf16>, vector<32x384xf32> -> vector<32x384xf32>
    %107 = arith.addf %102, %106 : vector<32x384xf32>
    %c0_97 = arith.constant 0 : index
    %c178 = arith.constant 178 : index
    %108 = vector.load %arg10[%c0_97, %c178] : memref<32x562xbf16, #tpu.memory_space<vmem>>, vector<32x384xbf16>
    %c8_98 = arith.constant 8 : index
    %c0_99 = arith.constant 0 : index
    %c0_100 = arith.constant 0 : index
    %109 = vector.load %arg5[%c8_98, %c0_99, %c0_100] : memref<9x32x32xbf16, #tpu.memory_space<vmem>>, vector<1x32x32xbf16>
    %110 = vector.shape_cast %109 : vector<1x32x32xbf16> to vector<32x32xbf16>
    %cst_101 = arith.constant dense<0.000000e+00> : vector<32x384xf32>
    %111 = tpu.matmul %110, %108, %cst_101 {dimension_numbers = #tpu.dot_dimension_numbers<[1], [0], [0], [1], [0, 0, 1, 1], [], []>} : vector<32x32xbf16>, vector<32x384xbf16>, vector<32x384xf32> -> vector<32x384xf32>
    %112 = arith.addf %107, %111 : vector<32x384xf32>
    %c0_102 = arith.constant 0 : index
    %c0_103 = arith.constant 0 : index
    %113 = vector.load %arg6[%c0_102, %c0_103] : memref<32x1xf32, #tpu.memory_space<vmem>>, vector<32x1xf32>
    %114 = vector.broadcast %113 : vector<32x1xf32> to vector<32x384xf32>
    %115 = arith.mulf %112, %114 : vector<32x384xf32>
    %c0_104 = arith.constant 0 : index
    %c0_105 = arith.constant 0 : index
    %116 = vector.load %arg7[%c0_104, %c0_105] : memref<32x1xf32, #tpu.memory_space<vmem>>, vector<32x1xf32>
    %117 = vector.broadcast %116 : vector<32x1xf32> to vector<32x384xf32>
    %118 = arith.addf %115, %117 : vector<32x384xf32>
    %c0_106 = arith.constant 0 : index
    %c0_107 = arith.constant 0 : index
    %c0_108 = arith.constant 0 : index
    %119 = vector.load %arg1[%c0_106, %c0_107, %c0_108] : memref<1x32x384xf32, #tpu.memory_space<vmem>>, vector<1x32x384xf32>
    %120 = vector.shape_cast %119 : vector<1x32x384xf32> to vector<32x384xf32>
    %121 = arith.addf %118, %120 : vector<32x384xf32>
    %cst_109 = arith.constant 0.000000e+00 : f32
    %122 = vector.broadcast %cst_109 : f32 to vector<32x384xf32>
    %123 = arith.maximumf %121, %122 : vector<32x384xf32>
    %124 = vector.shape_cast %123 : vector<32x384xf32> to vector<1x32x384xf32>
    %c0_110 = arith.constant 0 : index
    %c0_111 = arith.constant 0 : index
    %c0_112 = arith.constant 0 : index
    %125 = vector.load %arg9[%c0_110, %c0_111, %c0_112] : memref<1x32x384xf32, #tpu.memory_space<vmem>>, vector<1x32x384xf32>
    tpu.vector_store %arg9[%c0_110, %c0_111, %c0_112], %124 {strides = array<i32>} : memref<1x32x384xf32, #tpu.memory_space<vmem>>, vector<1x32x384xf32>,
    return
  }
  func.func @transform_0(%arg0: i32) -> (i32, i32, i32) {
    %c0_i32 = arith.constant 0 : i32
    %c0_i32_0 = arith.constant 0 : i32
    %c0_i32_1 = arith.constant 0 : i32
    return %arg0, %c0_i32, %c0_i32_0 : i32, i32, i32
  }
  func.func @transform_1(%arg0: i32) -> (i32, i32, i32) {
    %c0_i32 = arith.constant 0 : i32
    %c0_i32_0 = arith.constant 0 : i32
    %c0_i32_1 = arith.constant 0 : i32
    %c0_i32_2 = arith.constant 0 : i32
    return %c0_i32, %c0_i32_0, %c0_i32_1 : i32, i32, i32
  }
  func.func @transform_2(%arg0: i32) -> (i32, i32) {
    %c0_i32 = arith.constant 0 : i32
    %c0_i32_0 = arith.constant 0 : i32
    %c0_i32_1 = arith.constant 0 : i32
    return %c0_i32, %c0_i32_0 : i32, i32
  }
  func.func @transform_3(%arg0: i32) -> (i32, i32) {
    %c0_i32 = arith.constant 0 : i32
    %c0_i32_0 = arith.constant 0 : i32
    %c0_i32_1 = arith.constant 0 : i32
    return %c0_i32, %c0_i32_0 : i32, i32
  }
  func.func @transform_4(%arg0: i32) -> (i32, i32, i32) {
    %c0_i32 = arith.constant 0 : i32
    %c0_i32_0 = arith.constant 0 : i32
    %c0_i32_1 = arith.constant 0 : i32
    %c0_i32_2 = arith.constant 0 : i32
    return %c0_i32, %c0_i32_0, %c0_i32_1 : i32, i32, i32
  }
  func.func @transform_5(%arg0: i32) -> (i32, i32) {
    %c0_i32 = arith.constant 0 : i32
    %c0_i32_0 = arith.constant 0 : i32
    %c0_i32_1 = arith.constant 0 : i32
    return %c0_i32, %c0_i32_0 : i32, i32
  }
  func.func @transform_6(%arg0: i32) -> (i32, i32) {
    %c0_i32 = arith.constant 0 : i32
    %c0_i32_0 = arith.constant 0 : i32
    %c0_i32_1 = arith.constant 0 : i32
    return %c0_i32, %c0_i32_0 : i32, i32
  }
  func.func @transform_7(%arg0: i32) -> (i32, i32) {
    %c0_i32 = arith.constant 0 : i32
    %c0_i32_0 = arith.constant 0 : i32
    %c0_i32_1 = arith.constant 0 : i32
    return %c0_i32, %c0_i32_0 : i32, i32
  }
  func.func @transform_8(%arg0: i32) -> (i32, i32, i32) {
    %c0_i32 = arith.constant 0 : i32
    %c0_i32_0 = arith.constant 0 : i32
    %c0_i32_1 = arith.constant 0 : i32
    return %arg0, %c0_i32, %c0_i32_0 : i32, i32, i32
  }
}

</mosaic_0001>

<bundles_post_ra>
// kernel: tpu_custom_call.1
= control target key start
LH: loop header
LB: loop body
LE: loop exit
PB: predicated region body
PF: predicated region fallthrough
CT: control target
= control target key end

     0   :  { %s5626_s0 = inlined_call_operand.hbm [shape: f32[2,32,384], index: 0, kind: input, shape index: {}]   ;;  %s5627_s1 = inlined_call_operand.hbm [shape: bf16[9,32,32], index: 1, kind: input, shape index: {}]   ;;  %s5628_s2 = inlined_call_operand.vmem [shape: f32[32,1], index: 2, kind: input, shape index: {}]   ;;  %s5629_s3 = inlined_call_operand.vmem [shape: f32[32,1], index: 3, kind: input, shape index: {}]   ;;  %s5630_s4 = inlined_call_operand.vmem [shape: bf16[9,32,32], index: 4, kind: input, shape index: {}]   ;;  %s5631_s5 = inlined_call_operand.vmem [shape: f32[32,1], index: 5, kind: input, shape index: {}]   ;;  %s5632_s6 = inlined_call_operand.vmem [shape: f32[32,1], index: 6, kind: input, shape index: {}]   ;;  %s5633_s7 = inlined_call_operand.vmem [shape: f32[1,384], index: 7, kind: input, shape index: {}]   ;;  %s5634_s8 = inlined_call_operand.hbm [shape: f32[2,32,384], index: 8, kind: output, shape index: {}]  }
   0x1   :  { %5640 = sst [smem:[#allocation13_spill]] %s5627_s1 }
   0x2   :  { %13 = vsyncpa [#allocation4], 0 }
   0x3   :  { %15 = vsyncpa [#allocation4 + $0x1], 0 }
   0x4   :  { %16 = vsyncpa [#allocation7], 0 }
   0x5   :  { %17 = vsyncpa [#allocation5], 0 }
   0x6   :  { %19 = vsyncpa [#allocation5 + $0x1], 0  ;;  %s4525_s27 = smov 0   ;;  %s4527_s28 = smov 0  }
   0x7   :  { %s4529_s29 = smov 0   ;;  %s4531_s30 = smov 0  }
   0x8 LB: > { %s4546_s9 = sadd.s32 4294967295, %s4453_s30   ;;  %s3621_s10 = sadd.s32 4294967294, %s4453_s30   ;;  %s4453_s30 = sphi %s4531_s30, %s5656_s30   ;;  %s4449_s29 = sphi %s4529_s29, %s5659_s29   ;;  %s4445_s28 = sphi %s4527_s28, %s5658_s28   ;;  %s4441_s27 = sphi %s4525_s27, %s5657_s27  }
   0x9   : > { %p45_p0 = scmp.ne.s32.totalorder %s4445_s28, %s4441_s27  ;;  %p5635_p1 = scmp.eq.s32.totalorder %s4546_s9, 0 }
   0xa   : > { %p222_p3 = scmp.eq.s32.totalorder %s3621_s10, 1  ;;  %p3622_p5 = scmp.ge.s32.totalorder %s4453_s30, 1 }
   0xb   : > { %p4555_p4 = por %p5635_p1, %p45_p0  ;;  %p229_p7 = scmp.lt.s32.totalorder %s4453_s30, 3 }
   0xc   : > { %p4560_p6 = por %p222_p3, %p45_p0  ;;  %s4455_s14 = smov [#allocation6]  }
   0xd   : > { %s5641_s11 = scalar_select %p4555_p4, 1, 0 }
   0xe   : > { %s5642_s12 = scalar_select %p4560_p6, 1, 0 }
   0xf   : > { %p4565_p8 = pnand %p3622_p5, %p229_p7  ;;  %s241_s15 = sshll.u32 %s4455_s14, 4  ;;  %s4569_s15 = int_to_ptr.vmem [resolvable:$true] %s241_s15 }
  0x10   : > { %s4581_s17 = sadd.s32 1, %s4453_s30   ;;  %s32_s18 = sadd.s32 1, %s4449_s29 }
  0x11   : > { %s5643_s13 = scalar_select %p4565_p8, 1, 0 }
  0x12   : > { %p4191_p9 = pneg %p4565_p8  ;;  %5645 = sst [smem:[#allocation12_spill]] %s4581_s17 }
  0x13   : > { %s29_s19 = ssub.s32 %s4453_s30, %s4581_s17  ;;  %s5646_s1 = sld [smem:[#allocation13_spill]] }
  0x14   : > { %p4576_p11 = pnand %p4191_p9, %p5635_p1 }
  0x16   : > { %p4327_p13 = pneg %p4576_p11 }
  0x19   : > { %s4325_s22 = scalar_lea.hbm %s5646_s1, 2304 }
  0x1a   : > { %p4326_p12 = scmp.ne.s32.totalorder %s5646_s1, %s4325_s22  ;;  %p4332_p5 = scmp.lt.u32.totalorder %s4325_s22, %s5646_s1 }
  0x1c   : > { %p4328_p0 = pnand %p4327_p13, %p4326_p12 }
  0x1e   : > { %p4329_p3 = pneg %p4328_p0 }
  0x20   : > { %p4334_p7 = pnand %p4332_p5, %p4329_p3 }
  0x22   : > { %4337 = shalt.err (!%p4334_p7)
}
  0x23   : > { %s4338_s10 = scalar_lea.vmem %s4569_s15, 2304  ;;  %p4346_p2 = scmp.lt.s32.totalorder %s4569_s15, %s4569_s15 }
  0x24   : > { %p4339_p9 = scmp.ne.s32.totalorder %s4569_s15, %s4338_s10  ;;  %p4347_p6 = scmp.lt.s32.totalorder %s4338_s10, %s4338_s10 }
  0x26   : > { %p4341_p10 = pnand %p4339_p9, %p4327_p13  ;;  %p4348_p4 = por %p4347_p6, %p4346_p2 }
  0x28   : > { %p4342_p1 = pneg %p4341_p10 }
  0x2a   : > { %p4349_p8 = pnand %p4348_p4, %p4342_p1 }
  0x2c   : > { %4352 = shalt.err (!%p4349_p8)
}
  0x2d   : > { %s4456_s14 = smov 64   ;;  %s4457_s20 = smov 4  }
  0x2e   : > { %4194 = dma.hbm_to_vmem [thread:$0]  (!%p4576_p11), %s5646_s1, 2304, %s4569_s15, [#allocation7], %s4456_s14, %s4456_s14, %s4457_s20  }
  0x2f   : > { %p30_p2 = scmp.eq.s32.totalorder %s29_s19, 0  ;;  %p39_p1 = scmp.ne.s32.totalorder %s4449_s29, %s4445_s28 }
  0x30   : > { %p40_p4 = scmp.eq.s32.totalorder %s4453_s30, 0  ;;  %p4204_p6 = scmp.lt.s32.totalorder %s4453_s30, 2 }
  0x31   : > { %s4612_s23 = scalar_select %p30_p2, %s4449_s29, %s32_s18  }
  0x32   : > { %p41_p8 = por %p40_p4, %p39_p1  ;;  %p5647_p10 = scmp.eq.s32.totalorder %s4546_s9, 1 }
  0x33   : > { %s273_s25 = sand.u32 1, %s4449_s29   ;;  %s4180_s26 = smul.u32 1536, %s4453_s30 }
  0x34   : > { %p4616_p12 = por %p5647_p10, %p39_p1  ;;  %s4179_s10 = smul.u32 96, %s273_s25 }
  0x35   : > { %s4625_s21 = scalar_lea.hbm %s5626_s0, %s4180_s26  ;;  %p4627_p11 = pnand %p4204_p6, %p41_p8 }
  0x36   : > { %s277_s18 = scalar_lea.vmem [#allocation3], %s4179_s10  ;;  %s4633_s14 = scalar_lea.sflag [#allocation4], %s273_s25 }
  0x37   : > { %s284_s19 = sshll.u32 %s277_s18, 4  ;;  %s4353_s20 = scalar_lea.hbm %s4625_s21, 1536  ;;  %s4631_s19 = int_to_ptr.vmem [resolvable:$true] %s284_s19 }
  0x38   : > { %p4354_p13 = scmp.ne.s32.totalorder %s4625_s21, %s4353_s20  ;;  %p4355_p0 = pneg %p4627_p11 }
  0x39   : > { %s4358_s26 = scalar_lea.hbm %s5626_s0, 3072  ;;  %p4359_p7 = scmp.lt.u32.totalorder %s4625_s21, %s5626_s0 }
  0x3a   : > { %p4356_p3 = pnand %p4355_p0, %p4354_p13  ;;  %p4360_p9 = scmp.lt.u32.totalorder %s4358_s26, %s4353_s20 }
  0x3b   : > { %p4362_p1 = scmp.lt.u32.totalorder %s4353_s20, %s4625_s21 }
  0x3c   : > { %p4357_p5 = pneg %p4356_p3  ;;  %p4361_p2 = por %p4360_p9, %p4359_p7 }
  0x3e   : > { %p4363_p4 = por %p4362_p1, %p4361_p2 }
  0x40   : > { %p4364_p6 = pnand %p4363_p4, %p4357_p5 }
  0x42   : > { %4367 = shalt.err (!%p4364_p6)
}
  0x43   : > { %s4368_s25 = scalar_lea.vmem %s4631_s19, 1536  ;;  %s4458_s10 = smov [#allocation3]  }
  0x44   : > { %p4369_p8 = scmp.ne.s32.totalorder %s4631_s19, %s4368_s25  ;;  %s4373_s18 = sshll.u32 %s4458_s10, 4  ;;  %s4374_s18 = int_to_ptr.vmem [resolvable:$false] %s4373_s18 }
  0x45   : > { %s4375_s1 = scalar_lea.vmem %s4374_s18, 3072  ;;  %p4376_p3 = scmp.lt.s32.totalorder %s4631_s19, %s4374_s18 }
  0x46   : > { %p4371_p10 = pnand %p4369_p8, %p4355_p0  ;;  %p4377_p7 = scmp.lt.s32.totalorder %s4375_s1, %s4368_s25 }
  0x48   : > { %p4372_p13 = pneg %p4371_p10  ;;  %p4378_p9 = por %p4377_p7, %p4376_p3 }
  0x4a   : > { %p4379_p2 = pnand %p4378_p9, %p4372_p13 }
  0x4c   : > { %4382 = shalt.err (!%p4379_p2)
}
  0x4d   : > { %s4459_s20 = smov 384   ;;  %s4460_s17 = smov 24  }
  0x4e   : > { %4198 = dma.hbm_to_vmem [thread:$0]  (!%p4627_p11), %s4625_s21, 1536, %s4631_s19, %s4633_s14, %s4459_s20, %s4459_s20, %s4460_s17  }
  0x4f   : > { %p5650_p0 = scmp.ne.s32.totalorder %s5643_s13, 0 }
  0x50   : > { %s4664_s22 = sand.u32 (!%p5650_p0), 1, %s4445_s28   ;;  %p5651_p5 = scmp.ne.s32.totalorder (!%p5650_p0), %s5641_s11, 0 }
  0x51   : > { %296 = sbr.rel (%p5650_p0) target bundleno = 1105 (0x451), region = 52  ;;  %s299_s16 = scalar_lea.sflag (!%p5650_p0), [#allocation4], %s4664_s22 }
  0x52   : > { %s4181_s26 = smul.u32 (!%p5650_p0), 96, %s4664_s22 }
  0x54   : > { %s4670_s25 = scalar_lea.vmem (!%p5650_p0), [#allocation3], %s4181_s26 }
  0x58   : > { %4428 = dma.done.wait (%p5651_p5), %s299_s16, 1536  }
  0x59   : > { %4430 = vsyncadd (%p5651_p5), %s299_s16, 4294965760  ;;  %p5652_p11 = scmp.eq.s32.totalorder %s4546_s9, 0 }
  0x5b   : > { %4432 = dma.done.wait (%p5652_p11), [#allocation7], 2304   ;;  %p5653_p1 = pmov %p5652_p11 }
  0x5c   : > { %vm342_vm0 = vcmask 408576   ;;  %v4461_v0 = vmov 0   ;;  %s4462_s13 = smov 24   ;;  %v345_v1 = vld [vmem:[%s4670_s25] sm:$0xff]  ;;  %v348_v2 = vld [vmem:[%s4670_s25 + $0x18] sm:$0xff]  ;;  %v351_v3 = vld [vmem:[%s4670_s25 + $0x30] sm:$0xff] }
  0x5d   : > { %4434 = vsyncadd (%p5653_p1), [#allocation7], 4294964992  ;;  %340 = vst [vmem:[#allocation2] sm:$0xff] %v4461_v0  ;;  %404 = vrot.lane.b32.xlu1 %v4461_v0, %s4462_s13  ;;  %472 = vmatprep.mubr.bf16.mxu0 %v4461_v0  ;;  %v4693_v4 = vpack.c.bf16 %v348_v2, %v345_v1  ;;  %v354_v5 = vld [vmem:[%s4670_s25 + $0x48] sm:$0xff]  ;;  %v349_v7 = vld [vmem:[%s4670_s25 + $0x20] sm:$0xff]  ;;  %s4463_s11 = smov 25  }
  0x5e   : > { %343 = vst.msk [vmem:[#allocation2 + $0x20] sm:$0xff] %vm342_vm0, %v4461_v0  ;;  %344 = vst.msk [vmem:[#allocation2 + $0x48] sm:$0xff] %vm342_vm0, %v4461_v0  ;;  %4263 = vset.pattern.permute.xlu1 %v4461_v0  ;;  %4262 = vset.pattern.permute.xlu0 %v4461_v0  ;;  %v346_v6 = vld [vmem:[%s4670_s25 + $0x8] sm:$0xff]  ;;  %v4698_v8 = vpack.c.bf16 %v354_v5, %v351_v3  ;;  %v352_v10 = vld [vmem:[%s4670_s25 + $0x38] sm:$0xff]  ;;  %vm433_vm1 = vcmask 261120   ;;  %s4464_s21 = smov 23  }
  0x5f   : > { %406 = vrot.lane.b32.xlu0 %v4693_v4, %s4462_s13  ;;  %v4702_v9 = vpack.c.bf16 %v349_v7, %v346_v6  ;;  %v355_v11 = vld [vmem:[%s4670_s25 + $0x50] sm:$0xff]  ;;  %v353_v12 = vld [vmem:[%s4670_s25 + $0x40] sm:$0xff]  ;;  %v356_v13 = vld [vmem:[%s4670_s25 + $0x58] sm:$0xff]  ;;  %s4465_s15 = smov 1   ;;  %s4466_s19 = smov 127   ;;  %vm420_vm2 = vcmask 195584  }
  0x60   : > { %v347_v14 = vld [vmem:[%s4670_s25 + $0x10] sm:$0xff]  ;;  %v4713_v15 = vpack.c.bf16 %v355_v11, %v352_v10  ;;  %v4717_v16 = vpack.c.bf16 %v356_v13, %v353_v12  ;;  %v350_v17 = vld [vmem:[%s4670_s25 + $0x28] sm:$0xff]  ;;  %v4733_v19 = vld [vmem:[#allocation6] sm:$0xff]   ;;  %s4467_s14 = smov 105   ;;  %s4468_s10 = smov 104   ;;  %vm568_vm3 = vcmask 203776  }
  0x61   : > { %414 = vrot.lane.b32.xlu1 %v4698_v8, %s4462_s13  ;;  %v4722_v18 = vpack.c.bf16 %v350_v17, %v347_v14  ;;  %3855 = vmatprep.mubr.msk.bf16.mxu1 %vm433_vm1, %v4733_v19  ;;  %s4469_s18 = smov 103   ;;  %v4264_v33 = vld [vmem:[#allocation6 + $0x10] sm:$0xff]   ;;  %v4265_v41 = vld [vmem:[#allocation6 + $0x18] sm:$0xff]   ;;  %vm720_vm4 = vcmask 187392   ;;  %v1826_v62 = vld [vmem:[%s5628_s2 + $0x10] sm:$0xff]  ;;  %vm884_vm5 = vcmask 7168  }
  0x62   : > { %v1825_v50 = vld [vmem:[%s5628_s2 + $0x8] sm:$0xff]  ;;  %v1824_v51 = vld [vmem:[%s5628_s2] sm:$0xff]  ;;  %v1827_v63 = vld [vmem:[%s5628_s2 + $0x18] sm:$0xff]  ;;  %vm1199_vm6 = vcmask 1039360   ;;  %vm1363_vm7 = vcmask 859136   ;;  %vm1527_vm8 = vcmask 850944  }
  0x63   : > { %408 = vrot.lane.b32.xlu0 %v4702_v9, %s4462_s13  ;;  %v1860_v55 = vld [vmem:[%s5629_s3] sm:$0xff]  ;;  %v1861_v57 = vld [vmem:[%s5629_s3 + $0x8] sm:$0xff]  ;;  %v1862_v6 = vld [vmem:[%s5629_s3 + $0x10] sm:$0xff]  ;;  %vm1691_vm9 = vcmask 842752   ;;  %s4472_s1 = smov 46   ;;  %s4473_s20 = smov 2  }
  0x64   : > { %v4267_v7 = vld [vmem:[#allocation6 + $0x8] sm:$0xff]   ;;  %s4474_s17 = smov 126   ;;  %s4475_s16 = smov 82   ;;  %vm2001_vm14 = vcmask 392192   ;;  %vm2300_vm15 = vcmask 375808  }
  0x65   : > { %412 = vrot.lane.b32.xlu1 %v4461_v0, %s4462_s13  ;;  %v4762_v20 = vld [vmem:[#allocation2 + $0x20] sm:$0xff]  ;;  %v4768_v21 = vld [vmem:[#allocation2 + $0x48] sm:$0xff]  ;;  %v1863_v10 = vld [vmem:[%s5629_s3 + $0x18] sm:$0xff] }
  0x67   : > { %416 = vrot.lane.b32.xlu0 %v4713_v15, %s4462_s13 }
  0x69   : > { %418 = vrot.lane.b32.xlu1 %v4717_v16, %s4462_s13 }
  0x6b   : > { %410 = vrot.lane.b32.xlu0 %v4722_v18, %s4462_s13 }
  0x6d   : > { %556 = vrot.lane.b32.xlu1 %v4702_v9, %s4463_s11 }
  0x6f   : > { %554 = vrot.lane.b32.xlu0 %v4693_v4, %s4463_s11 }
  0x71   : > { %562 = vrot.lane.b32.xlu1 %v4698_v8, %s4463_s11 }
  0x73   : > { %552 = vrot.lane.b32.xlu0 %v4461_v0, %s4463_s11 }
  0x75   : > { %560 = vrot.lane.b32.xlu1 %v4461_v0, %s4463_s11 }
  0x77   : > { %564 = vrot.lane.b32.xlu0 %v4713_v15, %s4463_s11 }
  0x79   : > { %708 = vrot.lane.b32.xlu1 %v4702_v9, %s4464_s21 }
  0x7b   : > { %706 = vrot.lane.b32.xlu0 %v4693_v4, %s4464_s21 }
  0x7d   : > { %714 = vrot.lane.b32.xlu1 %v4698_v8, %s4464_s21 }
  0x7f   : > { %704 = vrot.lane.b32.xlu0 %v4461_v0, %s4464_s21 }
  0x81   : > { %712 = vrot.lane.b32.xlu1 %v4461_v0, %s4464_s21 }
  0x83   : > { %716 = vrot.lane.b32.xlu0 %v4713_v15, %s4464_s21 }
  0x85   : > { %870 = vrot.lane.b32.xlu1 %v4693_v4, %s4465_s15 }
  0x87   : > { %558 = vrot.lane.b32.xlu0 %v4722_v18, %s4463_s11 }
  0x89   : > { %868 = vrot.lane.b32.xlu1 %v4461_v0, %s4465_s15 }
  0x8b   : > { %872 = vrot.lane.b32.xlu0 %v4702_v9, %s4465_s15 }
  0x8d   : > { %878 = vrot.lane.b32.xlu1 %v4698_v8, %s4465_s15 }
  0x8f   : > { %566 = vrot.lane.b32.xlu0 %v4717_v16, %s4463_s11  ;;  %s4476_s11 = smov 80  }
  0x91   : > { %876 = vrot.lane.b32.xlu1 %v4461_v0, %s4465_s15 }
  0x93   : > { %880 = vrot.lane.b32.xlu0 %v4713_v15, %s4465_s15 }
  0x95   : > { %718 = vrot.lane.b32.xlu1 %v4717_v16, %s4464_s21 }
  0x97   : > { %710 = vrot.lane.b32.xlu0 %v4722_v18, %s4464_s21  ;;  %s4477_s21 = smov 78  }
  0x99   : > { %882 = vrot.lane.b32.xlu1 %v4717_v16, %s4465_s15 }
  0x9b   : > { %874 = vrot.lane.b32.xlu0 %v4722_v18, %s4465_s15 }
  0x9d   : > { %1187 = vrot.lane.b32.xlu1 %v4722_v18, %s4466_s19 }
  0x9f   : > { %1185 = vrot.lane.b32.xlu0 %v4702_v9, %s4466_s19 }
  0xa1   : > { %1193 = vrot.lane.b32.xlu1 %v4713_v15, %s4466_s19 }
  0xa3   : > { %1183 = vrot.lane.b32.xlu0 %v4693_v4, %s4466_s19 }
  0xa5   : > { %1191 = vrot.lane.b32.xlu1 %v4698_v8, %s4466_s19 }
  0xa7   : > { %1195 = vrot.lane.b32.xlu0 %v4717_v16, %s4466_s19 }
  0xa9   : > { %1349 = vrot.lane.b32.xlu1 %v4702_v9, %s4467_s14 }
  0xab   : > { %1189 = vrot.lane.b32.xlu0 %v4762_v20, %s4466_s19 }
  0xad   : > { %1347 = vrot.lane.b32.xlu1 %v4693_v4, %s4467_s14 }
  0xaf   : > { %1351 = vrot.lane.b32.xlu0 %v4722_v18, %s4467_s14 }
  0xb1   : > { %1357 = vrot.lane.b32.xlu1 %v4713_v15, %s4467_s14 }
  0xb3   : > { %1197 = vrot.lane.b32.xlu0 %v4768_v21, %s4466_s19  ;;  %s4470_s19 = smov 48  }
  0xb5   : > { %1355 = vrot.lane.b32.xlu1 %v4698_v8, %s4467_s14 }
  0xb7   : > { %1359 = vrot.lane.b32.xlu0 %v4717_v16, %s4467_s14 }
  0xb9   : > { %1361 = vrot.lane.b32.xlu1 %v4768_v21, %s4467_s14 }
  0xbb   : > { %1353 = vrot.lane.b32.xlu0 %v4762_v20, %s4467_s14  ;;  %s4471_s14 = smov 50  }
  0xbd   : > { %1515 = vrot.lane.b32.xlu1 %v4722_v18, %s4468_s10 }
  0xbf   : > { %1513 = vrot.lane.b32.xlu0 %v4702_v9, %s4468_s10 }
  0xc1   : > { %1521 = vrot.lane.b32.xlu1 %v4713_v15, %s4468_s10 }
  0xc3   : > { %1511 = vrot.lane.b32.xlu0 %v4693_v4, %s4468_s10 }
  0xc5   : > { %1519 = vrot.lane.b32.xlu1 %v4698_v8, %s4468_s10 }
  0xc7   : > { %1523 = vrot.lane.b32.xlu0 %v4717_v16, %s4468_s10 }
  0xc9   : > { %1525 = vrot.lane.b32.xlu1 %v4768_v21, %s4468_s10 }
  0xcb   : > { %1517 = vrot.lane.b32.xlu0 %v4762_v20, %s4468_s10 }
  0xcd   : > { %1679 = vrot.lane.b32.xlu1 %v4722_v18, %s4469_s18 }
  0xcf   : > { %v405_v22 = vpop.permute.xlu1 %404  ;;  %1677 = vrot.lane.b32.xlu0 %v4702_v9, %s4469_s18 }
  0xd1   : > { %1681 = vrot.lane.b32.xlu1 %v4762_v20, %s4469_s18  ;;  %v407_v23 = vpop.permute.xlu0 %406 }
  0xd2   : > { %v421_v28 = vsel %vm420_vm2, %v405_v22, %v407_v23  ;;  %v4268_v22 = vld [vmem:[#allocation6 + $0x20] sm:$0xff]  }
  0xd3   : > { %v415_v24 = vpop.permute.xlu1 %414  ;;  %1675 = vrot.lane.b32.xlu0 %v4693_v4, %s4469_s18 }
  0xd5   : > { %1687 = vrot.lane.b32.xlu1 %v4717_v16, %s4469_s18  ;;  %v409_v25 = vpop.permute.xlu0 %408 }
  0xd6   : > { %v422_v27 = vsel %vm420_vm2, %v407_v23, %v409_v25 }
  0xd7   : > { %v413_v26 = vpop.permute.xlu1 %412  ;;  %440 = vmatprep.subr.bf16.mxu0 %v422_v27  ;;  %1685 = vrot.lane.b32.xlu0 %v4713_v15, %s4469_s18 }
  0xd8   : > { %441 = vmatpush1.bf16.msra.mxu0 %v421_v28  ;;  %v424_v32 = vsel %vm420_vm2, %v413_v26, %v415_v24 }
  0xd9   : > { %1689 = vrot.lane.b32.xlu1 %v4768_v21, %s4469_s18  ;;  %v417_v29 = vpop.permute.xlu0 %416 }
  0xda   : > { %v425_v31 = vsel %vm420_vm2, %v415_v24, %v417_v29 }
  0xdb   : > { %v419_v30 = vpop.permute.xlu1 %418  ;;  %442 = vmatprep.subr.bf16.mxu0 %v425_v31  ;;  %1683 = vrot.lane.b32.xlu0 %v4698_v8, %s4469_s18  ;;  %v4269_v31 = vld [vmem:[#allocation6 + $0x28] sm:$0xff]  }
  0xdc   : > { %443 = vmatpush1.bf16.msra.mxu0 %v424_v32  ;;  %v426_v37 = vsel %vm420_vm2, %v417_v29, %v419_v30 }
  0xdd   : > { %v411_v34 = vpop.permute.xlu0 %410  ;;  %1835 = vperm.xlu1 %4263, %v1825_v50  }
  0xde   : > { %v423_v36 = vsel %vm420_vm2, %v409_v25, %v411_v34  ;;  %vm2464_vm2 = vcmask 15360  }
  0xdf   : > { %v557_v35 = vpop.permute.xlu1 %556  ;;  %3630 = vmatmul.mubr.msk.bf16.vlgmr.msra.gmra.mrb[0].mxu0 %vm433_vm1, %v4264_v33  ;;  %3843 = vmatprep.subr.bf16.mxu0 %v423_v36 }
  0xe0   : > { %3844 = vmatpush3.bf16.msra.mxu0 %v423_v36  ;;  %482 = vmatprep.mubr.bf16.mxu0 %v4461_v0 }
  0xe1   : > { %v555_v38 = vpop.permute.xlu0 %554  ;;  %3845 = vmatprep.subr.bf16.mxu0 %v426_v37  ;;  %1830 = vperm.xlu0 %4262, %v1824_v51  }
  0xe2   : > { %v570_v40 = vsel %vm568_vm3, %v555_v38, %v557_v35  ;;  %1866 = vperm.xlu1 %4263, %v1860_v55  }
  0xe3   : > { %v563_v39 = vpop.permute.xlu1 %562 }
  0xe4   : > { %3846 = vmatpush3.bf16.msra.mxu0 %v426_v37  ;;  %v4270_v37 = vld [vmem:[#allocation6 + $0x30] sm:$0xff]  }
  0xe5   : > { %v553_v42 = vpop.permute.xlu0 %552  ;;  %587 = vmatprep.subr.bf16.mxu0 %v570_v40  ;;  %1871 = vperm.xlu0 %4262, %v1861_v57  }
  0xe6   : > { %v569_v49 = vsel %vm568_vm3, %v553_v42, %v555_v38  ;;  %1840 = vperm.xlu1 %4263, %v1826_v62   ;;  %v4275_v62 = vld [vmem:[#allocation6 + $0x58] sm:$0xff]  }
  0xe7   : > { %v561_v43 = vpop.permute.xlu1 %560  ;;  %3631 = vmatmul.mubr.msk.bf16.gmra.mrb[4].mxu0 %vm433_vm1, %v4265_v41 }
  0xe8   : > { %3847 = vmatprep.mubr.msk.bf16.mxu0 %vm433_vm1, %v4264_v33  ;;  %v572_v56 = vsel %vm568_vm3, %v561_v43, %v563_v39 }
  0xe9   : > { %v565_v44 = vpop.permute.xlu0 %564  ;;  %1845 = vperm.xlu0 %4262, %v1827_v63  }
  0xea   : > { %v573_v48 = vsel %vm568_vm3, %v563_v39, %v565_v44  ;;  %1876 = vperm.xlu1 %4263, %v1862_v6  }
  0xeb   : > { %v4803_v45 = vpop.permute.xlu1 %708 }
  0xed   : > { %v707_v46 = vpop.permute.xlu0 %706  ;;  %1881 = vperm.xlu0 %4262, %v1863_v10  }
  0xee   : > { %v722_v54 = vsel %vm720_vm4, %v707_v46, %v4803_v45 }
  0xef   : > { %v715_v47 = vpop.permute.xlu1 %714  ;;  %3848 = vmatmul.mubr.msk.bf16.vlgmr.msra.gmra.mrb[8].mxu0 %vm433_vm1, %v4265_v41 }
  0xf0   : > { %588 = vmatpush1.bf16.msra.mxu0 %v569_v49  ;;  %619 = vmatprep.mubr.bf16.mxu0 %v4461_v0 }
  0xf1   : > { %589 = vmatprep.subr.bf16.mxu0 %v573_v48  ;;  %v705_v52 = vpop.permute.xlu0 %704 }
  0xf2   : > { %v721_v58 = vsel %vm720_vm4, %v705_v52, %v707_v46 }
  0xf3   : > { %v713_v53 = vpop.permute.xlu1 %712 }
  0xf4   : > { %590 = vmatpush1.bf16.msra.mxu0 %v572_v56  ;;  %v724_v1 = vsel %vm720_vm4, %v713_v53, %v715_v47  ;;  %v4274_v56 = vld [vmem:[#allocation6 + $0x50] sm:$0xff]  }
  0xf5   : > { %739 = vmatprep.subr.bf16.mxu0 %v722_v54  ;;  %v717_v59 = vpop.permute.xlu0 %716 }
  0xf6   : > { %v725_v61 = vsel %vm720_vm4, %v715_v47, %v717_v59 }
  0xf7   : > { %v871_v60 = vpop.permute.xlu1 %870  ;;  %3636 = vmatmul.mubr.msk.bf16.vlgmr.msra.gmra.mrb[0].mxu0 %vm433_vm1, %v4733_v19 }
  0xf8   : > { %740 = vmatpush1.bf16.msra.mxu0 %v721_v58  ;;  %629 = vmatprep.mubr.bf16.mxu0 %v4461_v0 }
  0xf9   : > { %v559_v2 = vpop.permute.xlu0 %558  ;;  %741 = vmatprep.subr.bf16.mxu0 %v725_v61 }
  0xfa   : > { %v571_v5 = vsel %vm568_vm3, %v557_v35, %v559_v2 }
  0xfb   : > { %v869_v3 = vpop.permute.xlu1 %868  ;;  %3851 = vmatprep.subr.bf16.mxu1 %v571_v5 }
  0xfc   : > { %3852 = vmatpush3.bf16.msra.mxu1 %v571_v5  ;;  %742 = vmatpush1.bf16.msra.mxu0 %v724_v1  ;;  %v885_v23 = vsel %vm884_vm5, %v869_v3, %v871_v60  ;;  %v4276_v5 = vld [vmem:[#allocation6 + $0x60] sm:$0xff]  }
  0xfd   : > { %v873_v11 = vpop.permute.xlu0 %872 }
  0xfe   : > { %v886_v13 = vsel %vm884_vm5, %v871_v60, %v873_v11 }
  0xff   : > { %v879_v12 = vpop.permute.xlu1 %878  ;;  %3637 = vmatmul.mubr.msk.bf16.gmra.mrb[4].mxu0 %vm433_vm1, %v4267_v7  ;;  %903 = vmatprep.subr.bf16.mxu0 %v886_v13 }
 0x100   : > { %771 = vmatprep.mubr.bf16.mxu0 %v4461_v0 }
 0x101   : > { %v567_v14 = vpop.permute.xlu0 %566 }
 0x102   : > { %v574_v19 = vsel %vm568_vm3, %v565_v44, %v567_v14  ;;  %v4271_v44 = vld [vmem:[#allocation6 + $0x38] sm:$0xff]  }
 0x103   : > { %v877_v17 = vpop.permute.xlu1 %876  ;;  %3853 = vmatprep.subr.bf16.mxu1 %v574_v19 }
 0x104   : > { %3854 = vmatpush3.bf16.msra.mxu1 %v574_v19  ;;  %v888_v27 = vsel %vm884_vm5, %v877_v17, %v879_v12  ;;  %v4277_v19 = vld [vmem:[#allocation6 + $0x68] sm:$0xff]  }
 0x105   : > { %v881_v24 = vpop.permute.xlu0 %880 }
 0x106   : > { %v889_v26 = vsel %vm884_vm5, %v879_v12, %v881_v24 }
 0x107   : > { %v719_v25 = vpop.permute.xlu1 %718  ;;  %3856 = vmatmul.mubr.msk.bf16.vlgmr.msra.gmra.mrb[0].mxu1 %vm433_vm1, %v4267_v7  ;;  %3642 = vmatmul.mubr.msk.bf16.vlgmr.msra.gmra.mrb[0].mxu0 %vm433_vm1, %v4268_v22 }
 0x108   : > { %904 = vmatpush1.bf16.msra.mxu0 %v885_v23  ;;  %781 = vmatprep.mubr.bf16.mxu0 %v4461_v0  ;;  %v726_v32 = vsel %vm720_vm4, %v717_v59, %v719_v25 }
 0x109   : > { %v711_v28 = vpop.permute.xlu0 %710  ;;  %905 = vmatprep.subr.bf16.mxu0 %v889_v26  ;;  %3863 = vmatprep.mubr.msk.bf16.mxu1 %vm433_vm1, %v4268_v22  ;;  %v4278_v22 = vld [vmem:[#allocation6 + $0x70] sm:$0xff]  }
 0x10a   : > { %v723_v29 = vsel %vm720_vm4, %v4803_v45, %v711_v28 }
 0x10b   : > { %v883_v30 = vpop.permute.xlu1 %882  ;;  %3859 = vmatprep.subr.bf16.mxu1 %v723_v29 }
 0x10c   : > { %3860 = vmatpush3.bf16.msra.mxu1 %v723_v29  ;;  %906 = vmatpush1.bf16.msra.mxu0 %v888_v27  ;;  %v890_v39 = vsel %vm884_vm5, %v881_v24, %v883_v30 }
 0x10d   : > { %v875_v33 = vpop.permute.xlu0 %874  ;;  %3861 = vmatprep.subr.bf16.mxu1 %v726_v32  ;;  %1038 = vmatprep.subr.bf16.mxu0 %v4702_v9 }
 0x10e   : > { %v887_v35 = vsel %vm884_vm5, %v873_v11, %v875_v33  ;;  %v4279_v33 = vld [vmem:[#allocation6 + $0x78] sm:$0xff]  }
 0x10f   : > { %v1188_v34 = vpop.permute.xlu1 %1187  ;;  %3643 = vmatmul.mubr.msk.bf16.gmra.mrb[4].mxu0 %vm433_vm1, %v4269_v31 }
 0x110   : > { %3862 = vmatpush3.bf16.msra.mxu1 %v726_v32  ;;  %935 = vmatprep.mubr.bf16.mxu0 %v4461_v0 }
 0x111   : > { %3867 = vmatprep.subr.bf16.mxu1 %v887_v35  ;;  %v1186_v36 = vpop.permute.xlu0 %1185 }
 0x112   : > { %v1201_v42 = vsel %vm1199_vm6, %v1186_v36, %v1188_v34 }
 0x113   : > { %v1194_v38 = vpop.permute.xlu1 %1193  ;;  %3864 = vmatmul.mubr.msk.bf16.vlgmr.msra.gmra.mrb[0].mxu1 %vm433_vm1, %v4269_v31 }
 0x114   : > { %3868 = vmatpush3.bf16.msra.mxu1 %v887_v35  ;;  %3871 = vmatprep.mubr.msk.bf16.mxu1 %vm433_vm1, %v4270_v37  ;;  %v4280_v35 = vld [vmem:[#allocation6 + $0x80] sm:$0xff]  }
 0x115   : > { %3869 = vmatprep.subr.bf16.mxu1 %v890_v39  ;;  %v1184_v9 = vpop.permute.xlu0 %1183 }
 0x116   : > { %v1200_v48 = vsel %vm1199_vm6, %v1184_v9, %v1186_v36 }
 0x117   : > { %v1192_v40 = vpop.permute.xlu1 %1191  ;;  %3648 = vmatmul.mubr.msk.bf16.vlgmr.msra.gmra.mrb[0].mxu0 %vm433_vm1, %v4270_v37 }
 0x118   : > { %3870 = vmatpush3.bf16.msra.mxu1 %v890_v39  ;;  %1039 = vmatpush1.bf16.msra.mxu0 %v4693_v4  ;;  %v4272_v4 = vld [vmem:[#allocation6 + $0x40] sm:$0xff]   ;;  %v1203_v52 = vsel %vm1199_vm6, %v1192_v40, %v1194_v38  ;;  %v4281_v40 = vld [vmem:[#allocation6 + $0x88] sm:$0xff]  }
 0x119   : > { %v1196_v41 = vpop.permute.xlu0 %1195  ;;  %945 = vmatprep.mubr.bf16.mxu0 %v4461_v0  ;;  %1040 = vmatprep.subr.bf16.mxu0 %v4713_v15 }
 0x11a   : > { %3875 = vmatprep.subr.bf16.mxu1 %v4722_v18  ;;  %v1204_v50 = vsel %vm1199_vm6, %v1194_v38, %v1196_v41 }
 0x11b   : > { %v1350_v43 = vpop.permute.xlu1 %1349 }
 0x11c   : > { %1041 = vmatpush1.bf16.msra.mxu0 %v4698_v8 }
 0x11d   : > { %v1190_v45 = vpop.permute.xlu0 %1189  ;;  %1218 = vmatprep.subr.bf16.mxu0 %v1201_v42 }
 0x11e   : > { %v1202_v47 = vsel %vm1199_vm6, %v1188_v34, %v1190_v45 }
 0x11f   : > { %v1348_v46 = vpop.permute.xlu1 %1347  ;;  %3649 = vmatmul.mubr.msk.bf16.gmra.mrb[4].mxu0 %vm433_vm1, %v4271_v44  ;;  %3872 = vmatmul.mubr.msk.bf16.vlgmr.msra.gmra.mrb[0].mxu1 %vm433_vm1, %v4271_v44 }
 0x120   : > { %3876 = vmatpush3.bf16.msra.mxu1 %v4722_v18  ;;  %1070 = vmatprep.mubr.bf16.mxu0 %v4461_v0  ;;  %v4273_v18 = vld [vmem:[#allocation6 + $0x48] sm:$0xff]   ;;  %v1364_v6 = vsel %vm1363_vm7, %v1348_v46, %v1350_v43 }
 0x121   : > { %3877 = vmatprep.subr.bf16.mxu1 %v4717_v16  ;;  %v1352_v15 = vpop.permute.xlu0 %1351  ;;  %3879 = vmatprep.mubr.msk.bf16.mxu1 %vm433_vm1, %v4272_v4 }
 0x122   : > { %v1365_v54 = vsel %vm1363_vm7, %v1350_v43, %v1352_v15 }
 0x123   : > { %v1358_v8 = vpop.permute.xlu1 %1357 }
 0x124   : > { %3878 = vmatpush3.bf16.msra.mxu1 %v4717_v16 }
 0x125   : > { %3883 = vmatprep.subr.bf16.mxu1 %v1202_v47  ;;  %v1198_v49 = vpop.permute.xlu0 %1197 }
 0x126   : > { %v1205_v16 = vsel %vm1199_vm6, %v1196_v41, %v1198_v49  ;;  %vm2779_vm6 = vcmask 1031168  }
 0x127   : > { %v1356_v51 = vpop.permute.xlu1 %1355  ;;  %3654 = vmatmul.mubr.msk.bf16.vlgmr.msra.gmra.mrb[0].mxu0 %vm433_vm1, %v4272_v4 }
 0x128   : > { %1219 = vmatpush1.bf16.msra.mxu0 %v1200_v48  ;;  %1080 = vmatprep.mubr.bf16.mxu0 %v4461_v0  ;;  %v1367_v7 = vsel %vm1363_vm7, %v1356_v51, %v1358_v8  ;;  %v1908_v48 = vld [vmem:[%s5633_s7] sm:$0x7] }
 0x129   : > { %1220 = vmatprep.subr.bf16.mxu0 %v1204_v50  ;;  %v1360_v53 = vpop.permute.xlu0 %1359  ;;  %vm1909_vm10 = vcmp.gt.f32.partialorder %v1908_v48, 0.5 }
 0x12a   : > { %v1368_v1 = vsel %vm1363_vm7, %v1358_v8, %v1360_v53  ;;  %v1911_v8 = vlaneseq }
 0x12b   : > { %v1362_v55 = vpop.permute.xlu1 %1361  ;;  %3880 = vmatmul.mubr.msk.bf16.vlgmr.msra.gmra.mrb[0].mxu1 %vm433_vm1, %v4273_v18 }
 0x12c   : > { %1221 = vmatpush1.bf16.msra.mxu0 %v1203_v52  ;;  %3884 = vmatpush3.bf16.msra.mxu1 %v1202_v47  ;;  %v1369_v2 = vsel %vm1363_vm7, %v1360_v53, %v1362_v55  ;;  %v1912_v50 = vshrl.u32 %v1911_v8, 7 }
 0x12d   : > { %3885 = vmatprep.subr.bf16.mxu1 %v1205_v16  ;;  %v1354_v57 = vpop.permute.xlu0 %1353  ;;  %1382 = vmatprep.subr.bf16.mxu0 %v1365_v54  ;;  %v1910_v54 = vsel %vm1909_vm10, 1, %v4461_v0 }
 0x12e   : > { %v1366_v58 = vsel %vm1363_vm7, %v1352_v15, %v1354_v57  ;;  %3887 = vmatprep.mubr.msk.bf16.mxu1 %vm433_vm1, %v4274_v56  ;;  %v1921_v52 = vsub.s32 2, %v1912_v50  ;;  %vm2943_vm7 = vcmask 670720  }
 0x12f   : > { %v1516_v59 = vpop.permute.xlu1 %1515  ;;  %3655 = vmatmul.mubr.msk.bf16.gmra.mrb[4].mxu0 %vm433_vm1, %v4273_v18 }
 0x130   : > { %3886 = vmatpush3.bf16.msra.mxu1 %v1205_v16  ;;  %1250 = vmatprep.mubr.bf16.mxu0 %v4461_v0 }
 0x131   : > { %3891 = vmatprep.subr.bf16.mxu1 %v1366_v58  ;;  %v1514_v60 = vpop.permute.xlu0 %1513 }
 0x132   : > { %v1529_v11 = vsel %vm1527_vm8, %v1514_v60, %v1516_v59 }
 0x133   : > { %v1522_v61 = vpop.permute.xlu1 %1521 }
 0x135   : > { %v1512_v63 = vpop.permute.xlu0 %1511 }
 0x136   : > { %v1528_v26 = vsel %vm1527_vm8, %v1512_v63, %v1514_v60 }
 0x137   : > { %v1520_v3 = vpop.permute.xlu1 %1519  ;;  %3660 = vmatmul.mubr.msk.bf16.vlgmr.msra.gmra.mrb[0].mxu0 %vm433_vm1, %v4274_v56  ;;  %3888 = vmatmul.mubr.msk.bf16.vlgmr.msra.gmra.mrb[0].mxu1 %vm433_vm1, %v4275_v62 }
 0x138   : > { %1383 = vmatpush1.bf16.msra.mxu0 %v1364_v6  ;;  %3892 = vmatpush3.bf16.msra.mxu1 %v1366_v58  ;;  %v1531_v30 = vsel %vm1527_vm8, %v1520_v3, %v1522_v61 }
 0x139   : > { %1384 = vmatprep.subr.bf16.mxu0 %v1368_v1  ;;  %3893 = vmatprep.subr.bf16.mxu1 %v1369_v2  ;;  %v1524_v10 = vpop.permute.xlu0 %1523 }
 0x13a   : > { %1260 = vmatprep.mubr.bf16.mxu0 %v4461_v0  ;;  %3895 = vmatprep.mubr.msk.bf16.mxu1 %vm433_vm1, %v4276_v5  ;;  %v1532_v27 = vsel %vm1527_vm8, %v1522_v61, %v1524_v10 }
 0x13b   : > { %v1526_v12 = vpop.permute.xlu1 %1525 }
 0x13c   : > { %1385 = vmatpush1.bf16.msra.mxu0 %v1367_v7  ;;  %3894 = vmatpush3.bf16.msra.mxu1 %v1369_v2  ;;  %v1533_v23 = vsel %vm1527_vm8, %v1524_v10, %v1526_v12 }
 0x13d   : > { %v1518_v13 = vpop.permute.xlu0 %1517  ;;  %1546 = vmatprep.subr.bf16.mxu0 %v1529_v11 }
 0x13e   : > { %v1530_v14 = vsel %vm1527_vm8, %v1516_v59, %v1518_v13  ;;  %vm3271_vm8 = vcmask 637952  }
 0x13f   : > { %v1680_v17 = vpop.permute.xlu1 %1679  ;;  %3661 = vmatmul.mubr.msk.bf16.gmra.mrb[4].mxu0 %vm433_vm1, %v4275_v62  ;;  %3899 = vmatprep.subr.bf16.mxu1 %v1530_v14  ;;  %v4941_v62 = vrot.slane %v1910_v54, %v1921_v52 }
 0x140   : > { %1414 = vmatprep.mubr.bf16.mxu0 %v4461_v0 }
 0x141   : > { %v1678_v25 = vpop.permute.xlu0 %1677  ;;  %vm1925_vm11 = vcmp.eq.s32.totalorder %v4941_v62, 1 }
 0x142   : > { %v1693_v32 = vsel %vm1691_vm9, %v1678_v25, %v1680_v17  ;;  %vm4313_vm5 = vmpackc.low %vm1925_vm11, %vm1925_vm11 }
 0x143   : > { %v1682_v24 = vpop.permute.xlu1 %1681  ;;  %3896 = vmatmul.mubr.msk.bf16.vlgmr.msra.gmra.mrb[0].mxu1 %vm433_vm1, %v4277_v19 }
 0x144   : > { %3900 = vmatpush3.bf16.msra.mxu1 %v1530_v14  ;;  %3903 = vmatprep.mubr.msk.bf16.mxu1 %vm433_vm1, %v4278_v22  ;;  %v1694_v29 = vsel %vm1691_vm9, %v1680_v17, %v1682_v24  ;;  %v1913_v14 = vsub.s32 0, %v1912_v50 }
 0x145   : > { %3901 = vmatprep.subr.bf16.mxu1 %v1533_v23  ;;  %v1676_v31 = vpop.permute.xlu0 %1675 }
 0x146   : > { %v1692_v38 = vsel %vm1691_vm9, %v1676_v31, %v1678_v25 }
 0x147   : > { %v1688_v28 = vpop.permute.xlu1 %1687  ;;  %3666 = vmatmul.mubr.msk.bf16.vlgmr.msra.gmra.mrb[0].mxu0 %vm433_vm1, %v4276_v5 }
 0x148   : > { %1547 = vmatpush1.bf16.msra.mxu0 %v1528_v26  ;;  %3902 = vmatpush3.bf16.msra.mxu1 %v1533_v23 }
 0x149   : > { %1548 = vmatprep.subr.bf16.mxu0 %v1532_v27  ;;  %1424 = vmatprep.mubr.bf16.mxu0 %v4461_v0  ;;  %v1686_v37 = vpop.permute.xlu0 %1685 }
 0x14a   : > { %3907 = vmatprep.subr.bf16.mxu1 %v1694_v29  ;;  %v1696_v9 = vsel %vm1691_vm9, %v1686_v37, %v1688_v28 }
 0x14b   : > { %v1690_v34 = vpop.permute.xlu1 %1689 }
 0x14c   : > { %1549 = vmatpush1.bf16.msra.mxu0 %v1531_v30  ;;  %v1697_v36 = vsel %vm1691_vm9, %v1688_v28, %v1690_v34  ;;  %v4981_v30 = vrot.slane %v1910_v54, %v1913_v14 }
 0x14d   : > { %1710 = vmatprep.subr.bf16.mxu0 %v1693_v32  ;;  %v1684_v39 = vpop.permute.xlu0 %1683 }
 0x14e   : > { %v1695_v41 = vsel %vm1691_vm9, %v1684_v39, %v1686_v37  ;;  %vm1923_vm12 = vcmp.eq.s32.totalorder %v4981_v30, 1  ;;  %v4290_v30 = vld [vmem:[%s5630_s4 + $0x40] sm:$0xff]  }
 0x14f   : > { %3667 = vmatmul.mubr.msk.bf16.gmra.mrb[4].mxu0 %vm433_vm1, %v4277_v19  ;;  %3904 = vmatmul.mubr.msk.bf16.vlgmr.msra.gmra.mrb[0].mxu1 %vm433_vm1, %v4279_v33  ;;  %vm4304_vm4 = vmpackc.low %vm1923_vm12, %vm1923_vm12 }
 0x150   : > { %3908 = vmatpush3.bf16.msra.mxu1 %v1694_v29  ;;  %1578 = vmatprep.mubr.bf16.mxu0 %v4461_v0 }
 0x151   : > { %3909 = vmatprep.subr.bf16.mxu1 %v1697_v36  ;;  %3911 = vmatprep.mubr.msk.bf16.mxu1 %vm433_vm1, %v4280_v35 }
 0x154   : > { %3910 = vmatpush3.bf16.msra.mxu1 %v1697_v36 }
 0x157   : > { %3672 = vmatmul.mubr.msk.bf16.vlgmr.msra.gmra.mrb[0].mxu0 %vm433_vm1, %v4278_v22  ;;  %v1917_v22 = vsub.s32 1, %v1912_v50 }
 0x158   : > { %1711 = vmatpush1.bf16.msra.mxu0 %v1692_v38  ;;  %1588 = vmatprep.mubr.bf16.mxu0 %v4461_v0 }
 0x159   : > { %1712 = vmatprep.subr.bf16.mxu0 %v1696_v9  ;;  %v4985_v34 = vrot.slane %v1910_v54, %v1917_v22 }
 0x15b   : > { %3912 = vmatmul.mubr.msk.bf16.vlgmr.msra.gmra.mrb[0].mxu1 %vm433_vm1, %v4281_v40  ;;  %vm1924_vm13 = vcmp.eq.s32.totalorder %v4985_v34, 1 }
 0x15c   : > { %1713 = vmatpush1.bf16.msra.mxu0 %v1695_v41  ;;  %v1836_v46 = vpop.permute.xlu1 %1835  ;;  %vm4301_vm3 = vmpackc.low %vm1924_vm13, %vm1924_vm13 }
 0x15f   : > { %3673 = vmatmul.mubr.msk.bf16.gmra.mrb[4].mxu0 %vm433_vm1, %v4279_v33 }
 0x160   : > { %1742 = vmatprep.mubr.bf16.mxu0 %v4461_v0  ;;  %v1831_v4 = vpop.permute.xlu0 %1830 }
 0x161   : > { %v1867_v15 = vpop.permute.xlu1 %1866 }
 0x164   : > { %v1872_v47 = vpop.permute.xlu0 %1871 }
 0x165   : > { %v4933_v49 = vpop.permute.xlu1 %1840 }
 0x167   : > { %3678 = vmatmul.mubr.msk.bf16.vlgmr.msra.gmra.mrb[0].mxu0 %vm433_vm1, %v4280_v35 }
 0x168   : > { %1752 = vmatprep.mubr.bf16.mxu0 %v4461_v0  ;;  %v4935_v51 = vpop.permute.xlu0 %1845 }
 0x169   : > { %v4938_v57 = vpop.permute.xlu1 %1876 }
 0x16c   : > { %v4943_v1 = vpop.permute.xlu0 %1881 }
 0x16f   : > { %3679 = vmatmul.mubr.msk.bf16.gmra.mrb[4].mxu0 %vm433_vm1, %v4281_v40 }
 0x170   : > { %2052 = vmatprep.mubr.bf16.mxu0 %v4461_v0 }
 0x1c2   : > { %v3849_v42 = vpop.f32.mrb[8].mxu0 }
 0x1c3   : > { %v527_v43 = vpop.f32.mrb[9].mxu0 }
 0x1c4   : > { %v3850_v44 = vpop.f32.mrb[10].mxu0 }
 0x1c5   : > { %v530_v45 = vpop.f32.mrb[11].mxu0 }
 0x22e   : > { %v3913_v18 = vpop.f32.mrb[0].mxu1 }
 0x22f   : > { %v3987_v53 = vadd.f32 %v3913_v18, %v3849_v42  ;;  %v1797_v16 = vpop.f32.mrb[1].mxu1 }
 0x230   : > { %v3988_v55 = vadd.f32 %v1797_v16, %v527_v43  ;;  %v3914_v56 = vpop.f32.mrb[2].mxu1 }
 0x231   : > { %v1856_v58 = vmul.f32 %v3987_v53, %v4933_v49  ;;  %v3989_v59 = vadd.f32 %v3914_v56, %v3850_v44  ;;  %v1800_v60 = vpop.f32.mrb[3].mxu1 }
 0x232   : > { %v1850_v61 = vmul.f32 %v3988_v55, %v1831_v4  ;;  %v3990_v63 = vadd.f32 %v1800_v60, %v530_v45  ;;  %v5034_v55 = vld [vmem:[%s5630_s4 + $0x10] sm:$0xff]  }
 0x233   : > { %v1859_v2 = vmul.f32 %v3989_v59, %v4935_v51  ;;  %v4947_v3 = vadd.f32 %v4938_v57, %v1856_v58  ;;  %3919 = vmatprep.mubr.msk.bf16.mxu1 %vm433_vm1, %v5034_v55 }
 0x234   : > { %v4949_v0 = vadd.f32 %v1867_v15, %v1850_v61  ;;  %v1853_v5 = vmul.f32 %v3990_v63, %v1836_v46 }
 0x235   : > { %v1904_v6 = vmax.f32 %v4947_v3, 0.0  ;;  %v4953_v7 = vadd.f32 %v4943_v1, %v1859_v2 }
 0x236   : > { %v1898_v10 = vmax.f32 %v4949_v0, 0.0  ;;  %v4957_v11 = vadd.f32 %v1872_v47, %v1853_v5 }
 0x237   : > { %v1907_v12 = vmax.f32 %v4953_v7, 0.0  ;;  %v1934_v17 = vsel %vm1925_vm11, %v1904_v6, 0.0 }
 0x238   : > { %v1901_v13 = vmax.f32 %v4957_v11, 0.0  ;;  %v1928_v23 = vsel %vm1925_vm11, %v1898_v10, 0.0  ;;  %v4291_v11 = vld [vmem:[%s5630_s4 + $0x48] sm:$0xff]  }
 0x239   : > { %v1937_v19 = vsel %vm1925_vm11, %v1907_v12, 0.0  ;;  %v4320_v62 = vpack.c.bf16 %v1907_v12, %v1904_v6 }
 0x23a   : > { %v1931_v24 = vsel %vm1925_vm11, %v1901_v13, 0.0  ;;  %v4977_v25 = vpack.c.bf16 %v1937_v19, %v1934_v17  ;;  %v1744_v26 = vpop.f32.mrb[0].mxu0  ;;  %v5100_v19 = vld [vmem:[#allocation2] sm:$0xff] }
 0x23b   : > { %v4979_v27 = vpack.c.bf16 %v1931_v24, %v1928_v23  ;;  %v1848_v28 = vmul.f32 %v1831_v4, %v1744_v26  ;;  %v1746_v29 = vpop.f32.mrb[1].mxu0 }
 0x23c   : > { %v1849_v31 = vmul.f32 %v1831_v4, %v1746_v29  ;;  %v1748_v32 = vpop.f32.mrb[2].mxu0 }
 0x23d   : > { %v4983_v33 = vadd.f32 %v1867_v15, %v1848_v28  ;;  %v1851_v35 = vmul.f32 %v1836_v46, %v1748_v32  ;;  %v1750_v36 = vpop.f32.mrb[3].mxu0  ;;  %1991 = vrot.lane.b32.xlu0 %v4979_v27, %s4470_s19  ;;  %v3405_v28 = vld [vmem:[%s5631_s5 + $0x8] sm:$0xff] }
 0x23e   : > { %v4989_v37 = vadd.f32 %v1867_v15, %v1849_v31  ;;  %v1852_v38 = vmul.f32 %v1836_v46, %v1750_v36 }
 0x23f   : > { %v1896_v39 = vmax.f32 %v4983_v33, 0.0  ;;  %v4992_v9 = vadd.f32 %v1872_v47, %v1851_v35 }
 0x240   : > { %v1897_v40 = vmax.f32 %v4989_v37, 0.0  ;;  %v4996_v41 = vadd.f32 %v1872_v47, %v1852_v38  ;;  %v5180_v38 = vld [vmem:[%s5630_s4 + $0x18] sm:$0xff]  }
 0x241   : > { %v1899_v42 = vmax.f32 %v4992_v9, 0.0  ;;  %1999 = vrot.lane.b32.xlu0 %v4977_v25, %s4470_s19  ;;  %v1926_v45 = vsel %vm1923_vm12, %v1896_v39, 0.0 }
 0x242   : > { %v1900_v43 = vmax.f32 %v4996_v41, 0.0  ;;  %v1754_v44 = vpop.f32.mrb[4].mxu0  ;;  %v1927_v47 = vsel %vm1924_vm13, %v1897_v40, 0.0 }
 0x243   : > { %v1929_v46 = vsel %vm1923_vm12, %v1899_v42, 0.0  ;;  %v1854_v4 = vmul.f32 %v4933_v49, %v1754_v44  ;;  %v1756_v15 = vpop.f32.mrb[5].mxu0  ;;  %v5185_v44 = vld [vmem:[%s5630_s4] sm:$0xff]   ;;  %v4305_v34 = vpack.c.bf16 %v1899_v42, %v1896_v39  ;;  %v4314_v39 = vpack.c.bf16 %v1901_v13, %v1898_v10 }
 0x244   : > { %v5016_v8 = vpack.c.bf16 %v1929_v46, %v1926_v45  ;;  %v1930_v48 = vsel %vm1924_vm13, %v1900_v43, 0.0  ;;  %v1855_v50 = vmul.f32 %v4933_v49, %v1756_v15  ;;  %v1758_v18 = vpop.f32.mrb[6].mxu0 }
 0x245   : > { %v5023_v52 = vpack.c.bf16 %v1930_v48, %v1927_v47  ;;  %v5026_v53 = vadd.f32 %v4938_v57, %v1854_v4  ;;  %v1857_v16 = vmul.f32 %v4935_v51, %v1758_v18  ;;  %v1760_v54 = vpop.f32.mrb[7].mxu0  ;;  %2138 = vrot.lane.b32.xlu0 %v4979_v27, %s4471_s14  ;;  %v3443_v4 = vld [vmem:[%s5632_s6 + $0x18] sm:$0xff]  ;;  %v3404_v47 = vld [vmem:[%s5631_s5] sm:$0xff] }
 0x246   : > { %v5037_v49 = vadd.f32 %v4938_v57, %v1855_v50  ;;  %v1858_v56 = vmul.f32 %v4935_v51, %v1760_v54  ;;  %v5219_v54 = vld [vmem:[%s5630_s4 + $0x8] sm:$0xff]  }
 0x247   : > { %v1902_v58 = vmax.f32 %v5026_v53, 0.0  ;;  %v5042_v59 = vadd.f32 %v4943_v1, %v1857_v16  ;;  %1989 = vrot.lane.b32.xlu1 %v5023_v52, %s4470_s19 }
 0x248   : > { %v1903_v60 = vmax.f32 %v5037_v49, 0.0  ;;  %v5050_v61 = vadd.f32 %v4943_v1, %v1858_v56  ;;  %v3440_v56 = vld [vmem:[%s5632_s6] sm:$0xff] }
 0x249   : > { %v1905_v57 = vmax.f32 %v5042_v59, 0.0  ;;  %2146 = vrot.lane.b32.xlu0 %v4977_v25, %s4471_s14  ;;  %v1932_v63 = vsel %vm1923_vm12, %v1902_v58, 0.0 }
 0x24a   : > { %v1906_v51 = vmax.f32 %v5050_v61, 0.0  ;;  %v1933_v1 = vsel %vm1924_vm13, %v1903_v60, 0.0 }
 0x24b   : > { %v1935_v2 = vsel %vm1923_vm12, %v1905_v57, 0.0  ;;  %v4311_v33 = vpack.c.bf16 %v1905_v57, %v1902_v58 }
 0x24c   : > { %v5068_v5 = vpack.c.bf16 %v1935_v2, %v1932_v63  ;;  %v1936_v14 = vsel %vm1924_vm13, %v1906_v51, 0.0  ;;  %v5227_v63 = vld [vmem:[%s5630_s4 + $0x20] sm:$0xff]   ;;  %v4308_v37 = vpack.c.bf16 %v1906_v51, %v1903_v60 }
 0x24d   : > { %v1942_v17 = vpack.c.bf16 %v1936_v14, %v1933_v1  ;;  %2290 = vrot.lane.b32.xlu0 %v4979_v27, %s4472_s1  ;;  %v3442_v14 = vld [vmem:[%s5632_s6 + $0x10] sm:$0xff] }
 0x24f   : > { %1997 = vrot.lane.b32.xlu1 %v1942_v17, %s4470_s19 }
 0x251   : > { %2298 = vrot.lane.b32.xlu0 %v4977_v25, %s4472_s1 }
 0x253   : > { %2136 = vrot.lane.b32.xlu1 %v5023_v52, %s4471_s14 }
 0x255   : > { %2454 = vrot.lane.b32.xlu0 %v4979_v27, %s4473_s20 }
 0x257   : > { %2144 = vrot.lane.b32.xlu1 %v1942_v17, %s4471_s14 }
 0x259   : > { %2462 = vrot.lane.b32.xlu0 %v4977_v25, %s4473_s20 }
 0x25b   : > { %2288 = vrot.lane.b32.xlu1 %v5023_v52, %s4472_s1 }
 0x25d   : > { %2767 = vrot.lane.b32.xlu0 %v4979_v27, %s4474_s17 }
 0x25f   : > { %2296 = vrot.lane.b32.xlu1 %v1942_v17, %s4472_s1 }
 0x261   : > { %2771 = vrot.lane.b32.xlu0 %v5068_v5, %s4474_s17 }
 0x263   : > { %2452 = vrot.lane.b32.xlu1 %v5023_v52, %s4473_s20 }
 0x265   : > { %2773 = vrot.lane.b32.xlu0 %v1942_v17, %s4474_s17 }
 0x267   : > { %2460 = vrot.lane.b32.xlu1 %v1942_v17, %s4473_s20 }
 0x269   : > { %2777 = vrot.lane.b32.xlu0 %v4768_v21, %s4474_s17 }
 0x26b   : > { %2765 = vrot.lane.b32.xlu1 %v5023_v52, %s4474_s17 }
 0x26d   : > { %2931 = vrot.lane.b32.xlu0 %v4979_v27, %s4475_s16 }
 0x26f   : > { %2763 = vrot.lane.b32.xlu1 %v5016_v8, %s4474_s17 }
 0x271   : > { %2935 = vrot.lane.b32.xlu0 %v5068_v5, %s4475_s16 }
 0x273   : > { %2775 = vrot.lane.b32.xlu1 %v4977_v25, %s4474_s17 }
 0x275   : > { %1985 = vrot.lane.b32.xlu0 %v5100_v19, %s4470_s19 }
 0x277   : > { %2769 = vrot.lane.b32.xlu1 %v4762_v20, %s4474_s17  ;;  %s5542_s17 = scalar_lea.vmem [#allocation8], %s4181_s26  ;;  %s4182_s26 = smul.u32 1536, %s4546_s9 }
 0x278   : > { %s3525_s9 = scalar_lea.sflag [#allocation5], %s4664_s22 }
 0x279   : > { %1993 = vrot.lane.b32.xlu0 %v5100_v19, %s4470_s19 }
 0x27b   : > { %2929 = vrot.lane.b32.xlu1 %v5023_v52, %s4475_s16 }
 0x27d   : > { %2937 = vrot.lane.b32.xlu0 %v1942_v17, %s4475_s16 }
 0x27f   : > { %2927 = vrot.lane.b32.xlu1 %v5016_v8, %s4475_s16 }
 0x281   : > { %2941 = vrot.lane.b32.xlu0 %v4768_v21, %s4475_s16 }
 0x283   : > { %2939 = vrot.lane.b32.xlu1 %v4977_v25, %s4475_s16 }
 0x285   : > { %2132 = vrot.lane.b32.xlu0 %v5100_v19, %s4471_s14 }
 0x287   : > { %1987 = vrot.lane.b32.xlu1 %v5016_v8, %s4470_s19 }
 0x289   : > { %3095 = vrot.lane.b32.xlu0 %v4979_v27, %s4476_s11 }
 0x28b   : > { %1995 = vrot.lane.b32.xlu1 %v5068_v5, %s4470_s19 }
 0x28d   : > { %2142 = vrot.lane.b32.xlu0 %v5068_v5, %s4471_s14 }
 0x28f   : > { %2933 = vrot.lane.b32.xlu1 %v4762_v20, %s4475_s16  ;;  %s3538_s16 = sshll.u32 %s5542_s17, 4  ;;  %s5579_s16 = int_to_ptr.vmem [resolvable:$true] %s3538_s16 }
 0x290   : > { %s4383_s19 = scalar_lea.vmem %s5579_s16, 1536 }
 0x291   : > { %3099 = vrot.lane.b32.xlu0 %v5068_v5, %s4476_s11  ;;  %p4384_p4 = scmp.ne.s32.totalorder %s5579_s16, %s4383_s19 }
 0x293   : > { %2134 = vrot.lane.b32.xlu1 %v5016_v8, %s4471_s14  ;;  %p4385_p6 = pnand %p4384_p4, %p4616_p12 }
 0x295   : > { %3101 = vrot.lane.b32.xlu0 %v1942_v17, %s4476_s11  ;;  %p4386_p8 = pneg %p4385_p6 }
 0x297   : > { %3093 = vrot.lane.b32.xlu1 %v5023_v52, %s4476_s11 }
 0x299   : > { %2284 = vrot.lane.b32.xlu0 %v5100_v19, %s4472_s1 }
 0x29b   : > { %3091 = vrot.lane.b32.xlu1 %v5016_v8, %s4476_s11 }
 0x29d   : > { %2294 = vrot.lane.b32.xlu0 %v5068_v5, %s4472_s1 }
 0x29f   : > { %2140 = vrot.lane.b32.xlu1 %v5100_v19, %s4471_s14 }
 0x2a1   : > { %3105 = vrot.lane.b32.xlu0 %v4768_v21, %s4476_s11 }
 0x2a3   : > { %3103 = vrot.lane.b32.xlu1 %v4977_v25, %s4476_s11 }
 0x2a5   : > { %3259 = vrot.lane.b32.xlu0 %v4979_v27, %s4477_s21 }
 0x2a7   : > { %2286 = vrot.lane.b32.xlu1 %v5016_v8, %s4472_s1 }
 0x2a9   : > { %3263 = vrot.lane.b32.xlu0 %v5068_v5, %s4477_s21 }
 0x2ab   : > { %3097 = vrot.lane.b32.xlu1 %v4762_v20, %s4476_s11 }
 0x2ad   : > { %3265 = vrot.lane.b32.xlu0 %v1942_v17, %s4477_s21 }
 0x2af   : > { %v1992_v22 = vpop.permute.xlu0 %1991  ;;  %2292 = vrot.lane.b32.xlu1 %v5100_v19, %s4472_s1 }
 0x2b1   : > { %2448 = vrot.lane.b32.xlu0 %v5100_v19, %s4473_s20 }
 0x2b3   : > { %v2000_v23 = vpop.permute.xlu0 %1999  ;;  %3257 = vrot.lane.b32.xlu1 %v5023_v52, %s4477_s21 }
 0x2b5   : > { %2456 = vrot.lane.b32.xlu0 %v5100_v19, %s4473_s20 }
 0x2b7   : > { %v2139_v24 = vpop.permute.xlu0 %2138  ;;  %3255 = vrot.lane.b32.xlu1 %v5016_v8, %s4477_s21 }
 0x2b9   : > { %3269 = vrot.lane.b32.xlu0 %v4768_v21, %s4477_s21  ;;  %v5154_v26 = vpop.permute.xlu1 %1989  ;;  %v3407_v21 = vld [vmem:[%s5631_s5 + $0x18] sm:$0xff] }
 0x2ba   : > { %v2004_v27 = vsel %vm2001_vm14, %v5154_v26, %v1992_v22 }
 0x2bb   : > { %v2147_v29 = vpop.permute.xlu0 %2146  ;;  %3267 = vrot.lane.b32.xlu1 %v4977_v25, %s4477_s21  ;;  %3915 = vmatprep.subr.bf16.mxu1 %v2004_v27  ;;  %v3441_v25 = vld [vmem:[%s5632_s6 + $0x8] sm:$0xff] }
 0x2bc   : > { %3916 = vmatpush3.bf16.msra.mxu1 %v2004_v27 }
 0x2bd   : > { %3415 = vperm.xlu0 %4262, %v3405_v28   ;;  %v5255_v28 = vld [vmem:[%s5630_s4 + $0x28] sm:$0xff]  }
 0x2bf   : > { %v2291_v31 = vpop.permute.xlu0 %2290  ;;  %2450 = vrot.lane.b32.xlu1 %v5016_v8, %s4473_s20 }
 0x2c1   : > { %3425 = vperm.xlu0 %4262, %v3407_v21   ;;  %v5168_v32 = vpop.permute.xlu1 %1997 }
 0x2c2   : > { %v2007_v35 = vsel %vm2001_vm14, %v5168_v32, %v2000_v23 }
 0x2c3   : > { %v2299_v36 = vpop.permute.xlu0 %2298  ;;  %2458 = vrot.lane.b32.xlu1 %v5068_v5, %s4473_s20  ;;  %3917 = vmatprep.subr.bf16.mxu1 %v2007_v35  ;;  %s4478_s20 = smov [#allocation8]  }
 0x2c4   : > { %3918 = vmatpush3.bf16.msra.mxu1 %v2007_v35  ;;  %s4387_s14 = sshll.u32 %s4478_s20, 4  ;;  %s4388_s14 = int_to_ptr.vmem [resolvable:$false] %s4387_s14 }
 0x2c5   : > { %3451 = vperm.xlu0 %4262, %v3441_v25   ;;  %v5187_v45 = vpop.permute.xlu1 %2136  ;;  %s4389_s10 = scalar_lea.vmem %s4388_s14, 3072  ;;  %p4390_p10 = scmp.lt.s32.totalorder %s5579_s16, %s4388_s14 }
 0x2c6   : > { %v2151_v46 = vsel %vm342_vm0, %v5187_v45, %v2139_v24  ;;  %p4391_p13 = scmp.lt.s32.totalorder %s4389_s10, %s4383_s19 }
 0x2c7   : > { %v2455_v15 = vpop.permute.xlu0 %2454  ;;  %3261 = vrot.lane.b32.xlu1 %v4762_v20, %s4477_s21  ;;  %3920 = vmatmul.mubr.msk.bf16.vlgmr.msra.gmra.mrb[4].mxu1 %vm433_vm1, %v5180_v38  ;;  %v3406_v20 = vld [vmem:[%s5631_s5 + $0x10] sm:$0xff] }
 0x2c8   : > { %3923 = vmatprep.subr.bf16.mxu1 %v2151_v46  ;;  %3927 = vmatprep.mubr.msk.bf16.mxu1 %vm433_vm1, %v5185_v44  ;;  %p4392_p3 = por %p4391_p13, %p4390_p10 }
 0x2c9   : > { %3924 = vmatpush3.bf16.msra.mxu1 %v2151_v46  ;;  %3461 = vperm.xlu0 %4262, %v3443_v4   ;;  %v5203_v8 = vpop.permute.xlu1 %2144  ;;  %v4302_v46 = vpack.c.bf16 %v1900_v43, %v1897_v40 }
 0x2ca   : > { %v2154_v48 = vsel %vm342_vm0, %v5203_v8, %v2147_v29  ;;  %v5260_v29 = vld [vmem:[%s5630_s4 + $0x30] sm:$0xff]   ;;  %p4393_p7 = pnand %p4392_p3, %p4386_p8 }
 0x2cb   : > { %v2463_v50 = vpop.permute.xlu0 %2462  ;;  %3410 = vperm.xlu1 %4263, %v3404_v47   ;;  %3925 = vmatprep.subr.bf16.mxu1 %v2154_v48  ;;  %v5286_v47 = vld [vmem:[%s5630_s4 + $0x38] sm:$0xff]  }
 0x2cd   : > { %3926 = vmatpush3.bf16.msra.mxu1 %v2154_v48  ;;  %v5210_v18 = vpop.permute.xlu1 %2288 }
 0x2ce   : > { %v2303_v52 = vsel %vm2300_vm15, %v5210_v18, %v2291_v31 }
 0x2cf   : > { %v5214_v16 = vpop.permute.xlu0 %2767  ;;  %3420 = vperm.xlu1 %4263, %v3406_v20   ;;  %3931 = vmatprep.subr.bf16.mxu1 %v2303_v52 }
 0x2d1   : > { %v5229_v2 = vpop.permute.xlu1 %2296 }
 0x2d2   : > { %v2306_v1 = vsel %vm2300_vm15, %v5229_v2, %v2299_v36 }
 0x2d3   : > { %v5233_v5 = vpop.permute.xlu0 %2771  ;;  %3446 = vperm.xlu1 %4263, %v3440_v56   ;;  %3928 = vmatmul.mubr.msk.bf16.vlgmr.msra.gmra.mrb[4].mxu1 %vm433_vm1, %v5219_v54 }
 0x2d4   : > { %3932 = vmatpush3.bf16.msra.mxu1 %v2303_v52  ;;  %3935 = vmatprep.mubr.msk.bf16.mxu1 %vm433_vm1, %v5227_v63  ;;  %v4292_v52 = vld [vmem:[%s5630_s4 + $0x50] sm:$0xff]  }
 0x2d5   : > { %3933 = vmatprep.subr.bf16.mxu1 %v2306_v1  ;;  %v5242_v17 = vpop.permute.xlu1 %2452 }
 0x2d6   : > { %v2467_v22 = vsel %vm2464_vm2, %v5242_v17, %v2455_v15 }
 0x2d7   : > { %v5246_v23 = vpop.permute.xlu0 %2773  ;;  %3456 = vperm.xlu1 %4263, %v3442_v14   ;;  %v4293_v14 = vld [vmem:[%s5630_s4 + $0x58] sm:$0xff]  }
 0x2d8   : > { %3934 = vmatpush3.bf16.msra.mxu1 %v2306_v1 }
 0x2d9   : > { %3939 = vmatprep.subr.bf16.mxu1 %v2467_v22  ;;  %v5248_v24 = vpop.permute.xlu1 %2460 }
 0x2da   : > { %v2470_v35 = vsel %vm2464_vm2, %v5248_v24, %v2463_v50 }
 0x2db   : > { %v5250_v27 = vpop.permute.xlu0 %2777 }
 0x2dd   : > { %v5262_v21 = vpop.permute.xlu1 %2765 }
 0x2de   : > { %v2781_v13 = vsel %vm2779_vm6, %v5262_v21, %v5214_v16 }
 0x2df   : > { %v5264_v31 = vpop.permute.xlu0 %2931  ;;  %3936 = vmatmul.mubr.msk.bf16.vlgmr.msra.gmra.mrb[4].mxu1 %vm433_vm1, %v5255_v28 }
 0x2e0   : > { %3940 = vmatpush3.bf16.msra.mxu1 %v2467_v22  ;;  %3943 = vmatprep.mubr.msk.bf16.mxu1 %vm433_vm1, %v5260_v29 }
 0x2e1   : > { %3941 = vmatprep.subr.bf16.mxu1 %v2470_v35  ;;  %v2764_v25 = vpop.permute.xlu1 %2763 }
 0x2e2   : > { %v2780_v60 = vsel %vm2779_vm6, %v2764_v25, %v5262_v21 }
 0x2e3   : > { %v5272_v36 = vpop.permute.xlu0 %2935 }
 0x2e4   : > { %3942 = vmatpush3.bf16.msra.mxu1 %v2470_v35 }
 0x2e5   : > { %4303 = vmatprep.subr.msk.bf16.mxu1 %vm4301_vm3, %v4302_v46  ;;  %v5281_v4 = vpop.permute.xlu1 %2775 }
 0x2e6   : > { %v2784_v57 = vsel %vm2779_vm6, %v5246_v23, %v5281_v4 }
 0x2e7   : > { %v1986_v15 = vpop.permute.xlu0 %1985 }
 0x2e9   : > { %v5288_v48 = vpop.permute.xlu1 %2769 }
 0x2ea   : > { %v2782_v56 = vsel %vm2779_vm6, %v5214_v16, %v5288_v48 }
 0x2eb   : > { %v1994_v50 = vpop.permute.xlu0 %1993  ;;  %3944 = vmatmul.mubr.msk.bf16.vlgmr.msra.gmra.mrb[4].mxu1 %vm433_vm1, %v5286_v47 }
 0x2ec   : > { %4306 = vmatpush1.bf16.msk.msra.mxu1 %vm4304_vm4, %v4305_v34  ;;  %2650 = vmatprep.mubr.bf16.mxu1 %v5100_v19 }
 0x2ed   : > { %4309 = vmatprep.subr.msk.bf16.mxu1 %vm4301_vm3, %v4308_v37  ;;  %v5304_v40 = vpop.permute.xlu1 %2929  ;;  %v4294_v37 = vld [vmem:[%s5630_s4 + $0x60] sm:$0xff]  }
 0x2ef   : > { %v5306_v41 = vpop.permute.xlu0 %2937 }
 0x2f0   : > { %4312 = vmatpush1.bf16.msk.msra.mxu1 %vm4304_vm4, %v4311_v33 }
 0x2f1   : > { %4315 = vmatprep.subr.msk.bf16.mxu1 %vm4313_vm5, %v4314_v39  ;;  %v5322_v9 = vpop.permute.xlu1 %2927 }
 0x2f3   : > { %v5324_v42 = vpop.permute.xlu0 %2941  ;;  %3724 = vmatmul.mubr.msk.bf16.vlgmr.msra.gmra.mrb[8].mxu1 %vm433_vm1, %v4290_v30 }
 0x2f4   : > { %4318 = vmatpush3.bf16.msk.msra.mxu1 %vm4313_vm5, %v4314_v39  ;;  %2660 = vmatprep.mubr.bf16.mxu1 %v5100_v19 }
 0x2f5   : > { %4321 = vmatprep.subr.msk.bf16.mxu1 %vm4313_vm5, %v4320_v62  ;;  %v5332_v0 = vpop.permute.xlu1 %2939 }
 0x2f7   : > { %v2133_v10 = vpop.permute.xlu0 %2132 }
 0x2f8   : > { %4324 = vmatpush3.bf16.msk.msra.mxu1 %vm4313_vm5, %v4320_v62 }
 0x2f9   : > { %2798 = vmatprep.subr.bf16.mxu1 %v2781_v13  ;;  %v1988_v43 = vpop.permute.xlu1 %1987 }
 0x2fa   : > { %v2002_v3 = vsel %vm2001_vm14, %v1986_v15, %v1988_v43  ;;  %v2003_v6 = vsel %vm2001_vm14, %v1988_v43, %v5154_v26  ;;  %v2944_v15 = vsel %vm2943_vm7, %v5322_v9, %v5304_v40 }
 0x2fb   : > { %v5343_v7 = vpop.permute.xlu0 %3095  ;;  %2020 = vmatprep.subr.bf16.mxu0 %v2003_v6  ;;  %3725 = vmatmul.mubr.msk.bf16.gmra.mrb[12].mxu1 %vm433_vm1, %v4291_v11 }
 0x2fc   : > { %2021 = vmatpush1.bf16.msra.mxu0 %v2002_v3  ;;  %3951 = vmatprep.mubr.msk.bf16.mxu1 %vm433_vm1, %v4290_v30 }
 0x2fd   : > { %v1996_v12 = vpop.permute.xlu1 %1995 }
 0x2fe   : > { %v2005_v53 = vsel %vm2001_vm14, %v1994_v50, %v1996_v12  ;;  %v2006_v49 = vsel %vm2001_vm14, %v1996_v12, %v5168_v32  ;;  %v4296_v12 = vld [vmem:[%s5630_s4 + $0x70] sm:$0xff]  }
 0x2ff   : > { %v2143_v58 = vpop.permute.xlu0 %2142  ;;  %2022 = vmatprep.subr.bf16.mxu0 %v2006_v49 }
 0x300   : > { %2023 = vmatpush1.bf16.msra.mxu0 %v2005_v53 }
 0x301   : > { %v5350_v59 = vpop.permute.xlu1 %2933 }
 0x303   : > { %v5354_v61 = vpop.permute.xlu0 %3099  ;;  %3952 = vmatmul.mubr.msk.bf16.vlgmr.msra.gmra.mrb[4].mxu1 %vm433_vm1, %v4291_v11  ;;  %3688 = vmatmul.mubr.msk.bf16.vlgmr.msra.gmra.mrb[12].mxu0 %vm433_vm1, %v5034_v55  ;;  %v2783_v55 = vsel %vm2779_vm6, %v5233_v5, %v5246_v23  ;;  %v2785_v5 = vsel %vm2779_vm6, %v5281_v4, %v5250_v27 }
 0x304   : > { %2799 = vmatpush1.bf16.msra.mxu1 %v2780_v60  ;;  %2830 = vmatprep.mubr.bf16.mxu1 %v5100_v19 }
 0x305   : > { %2800 = vmatprep.subr.bf16.mxu1 %v2784_v57  ;;  %v2135_v51 = vpop.permute.xlu1 %2134  ;;  %2062 = vmatprep.mubr.bf16.mxu0 %v5100_v19 }
 0x306   : > { %v2149_v26 = vsel %vm342_vm0, %v2133_v10, %v2135_v51  ;;  %v2150_v32 = vsel %vm342_vm0, %v2135_v51, %v5187_v45  ;;  %v2153_v45 = vsel %vm342_vm0, %v2143_v58, %v5203_v8 }
 0x307   : > { %v5370_v20 = vpop.permute.xlu0 %3101  ;;  %2167 = vmatprep.subr.bf16.mxu0 %v2150_v32 }
 0x308   : > { %2801 = vmatpush1.bf16.msra.mxu1 %v2783_v55  ;;  %2168 = vmatpush1.bf16.msra.mxu0 %v2149_v26  ;;  %v4299_v26 = vld [vmem:[%s5630_s4 + $0x88] sm:$0xff]  }
 0x309   : > { %3955 = vmatprep.subr.bf16.mxu1 %v2782_v56  ;;  %2169 = vmatprep.subr.bf16.mxu0 %v2153_v45  ;;  %v5380_v1 = vpop.permute.xlu1 %3093 }
 0x30b   : > { %3734 = vmatmul.mubr.msk.bf16.vlgmr.msra.gmra.mrb[8].mxu1 %vm433_vm1, %v4292_v52  ;;  %3689 = vmatmul.mubr.msk.bf16.gmra.mrb[16].mxu0 %vm433_vm1, %v5180_v38  ;;  %v2285_v16 = vpop.permute.xlu0 %2284  ;;  %v2945_v38 = vsel %vm2943_vm7, %v5304_v40, %v5264_v31 }
 0x30c   : > { %3956 = vmatpush3.bf16.msra.mxu1 %v2782_v56  ;;  %2840 = vmatprep.mubr.bf16.mxu1 %v5100_v19 }
 0x30d   : > { %3957 = vmatprep.subr.bf16.mxu1 %v2785_v5  ;;  %v5389_v8 = vpop.permute.xlu1 %3091  ;;  %2199 = vmatprep.mubr.bf16.mxu0 %v5100_v19 }
 0x30f   : > { %v2295_v27 = vpop.permute.xlu0 %2294 }
 0x310   : > { %3958 = vmatpush3.bf16.msra.mxu1 %v2785_v5  ;;  %v2305_v48 = vsel %vm2300_vm15, %v2295_v27, %v5229_v2  ;;  %v2946_v2 = vsel %vm2943_vm7, %v5264_v31, %v5350_v59  ;;  %v4295_v31 = vld [vmem:[%s5630_s4 + $0x68] sm:$0xff]  }
 0x311   : > { %2962 = vmatprep.subr.bf16.mxu1 %v2945_v38  ;;  %v2141_v22 = vpop.permute.xlu1 %2140 }
 0x312   : > { %v2152_v23 = vsel %vm342_vm0, %v2141_v22, %v2143_v58  ;;  %vm3107_vm0 = vcmask 654336  }
 0x313   : > { %2170 = vmatpush1.bf16.msra.mxu0 %v2152_v23  ;;  %3735 = vmatmul.mubr.msk.bf16.gmra.mrb[12].mxu1 %vm433_vm1, %v4293_v14  ;;  %v5406_v35 = vpop.permute.xlu0 %3105  ;;  %v3109_v33 = vsel %vm3107_vm0, %v5380_v1, %v5343_v7  ;;  %v3108_v11 = vsel %vm3107_vm0, %v5389_v8, %v5380_v1  ;;  %v3111_v6 = vsel %vm3107_vm0, %v5354_v61, %v5370_v20 }
 0x314   : > { %3959 = vmatprep.mubr.msk.bf16.mxu1 %vm433_vm1, %v4292_v52 }
 0x315   : > { %v5401_v21 = vpop.permute.xlu1 %3103 }
 0x316   : > { %3694 = vmatmul.mubr.msk.bf16.vlgmr.msra.gmra.mrb[12].mxu0 %vm433_vm1, %v5185_v44  ;;  %v2948_v44 = vsel %vm2943_vm7, %v5306_v41, %v5332_v0 }
 0x317   : > { %2209 = vmatprep.mubr.bf16.mxu0 %v5100_v19  ;;  %v5426_v34 = vpop.permute.xlu0 %3259 }
 0x319   : > { %v2287_v25 = vpop.permute.xlu1 %2286 }
 0x31a   : > { %v2301_v46 = vsel %vm2300_vm15, %v2285_v16, %v2287_v25  ;;  %v2302_v4 = vsel %vm2300_vm15, %v2287_v25, %v5210_v18  ;;  %v2947_v18 = vsel %vm2943_vm7, %v5272_v36, %v5306_v41  ;;  %v2949_v36 = vsel %vm2943_vm7, %v5332_v0, %v5324_v42 }
 0x31b   : > { %2319 = vmatprep.subr.bf16.mxu0 %v2302_v4  ;;  %3960 = vmatmul.mubr.msk.bf16.vlgmr.msra.gmra.mrb[4].mxu1 %vm433_vm1, %v4293_v14  ;;  %v5441_v41 = vpop.permute.xlu0 %3263 }
 0x31c   : > { %2963 = vmatpush1.bf16.msra.mxu1 %v2944_v15  ;;  %2320 = vmatpush1.bf16.msra.mxu0 %v2301_v46  ;;  %v3476_v15 = vld [vmem:[%s4670_s25] sm:$0xff] }
 0x31d   : > { %2964 = vmatprep.subr.bf16.mxu1 %v2948_v44  ;;  %2321 = vmatprep.subr.bf16.mxu0 %v2305_v48  ;;  %v3098_v50 = vpop.permute.xlu1 %3097 }
 0x31e   : > { %2994 = vmatprep.mubr.bf16.mxu1 %v5100_v19  ;;  %3695 = vmatmul.mubr.msk.bf16.gmra.mrb[16].mxu0 %vm433_vm1, %v5219_v54  ;;  %v3110_v53 = vsel %vm3107_vm0, %v5343_v7, %v3098_v50  ;;  %v4297_v7 = vld [vmem:[%s5630_s4 + $0x78] sm:$0xff]  }
 0x31f   : > { %2351 = vmatprep.mubr.bf16.mxu0 %v5100_v19  ;;  %v3266_v9 = vpop.permute.xlu0 %3265 }
 0x320   : > { %2965 = vmatpush1.bf16.msra.mxu1 %v2947_v18  ;;  %v3275_v60 = vsel %vm3271_vm8, %v5441_v41, %v3266_v9  ;;  %v3477_v18 = vld [vmem:[%s4670_s25 + $0x8] sm:$0xff] }
 0x321   : > { %3963 = vmatprep.subr.bf16.mxu1 %v2946_v2  ;;  %v2293_v40 = vpop.permute.xlu1 %2292 }
 0x322   : > { %v2304_v54 = vsel %vm2300_vm15, %v2293_v40, %v2295_v27  ;;  %v3479_v40 = vld [vmem:[%s4670_s25 + $0x18] sm:$0xff] }
 0x323   : > { %2322 = vmatpush1.bf16.msra.mxu0 %v2304_v54  ;;  %3744 = vmatmul.mubr.msk.bf16.vlgmr.msra.gmra.mrb[8].mxu1 %vm433_vm1, %v4294_v37  ;;  %v2449_v42 = vpop.permute.xlu0 %2448 }
 0x324   : > { %3964 = vmatpush3.bf16.msra.mxu1 %v2946_v2  ;;  %3004 = vmatprep.mubr.bf16.mxu1 %v5100_v19 }
 0x325   : > { %3965 = vmatprep.subr.bf16.mxu1 %v2949_v36  ;;  %v3258_v30 = vpop.permute.xlu1 %3257 }
 0x326   : > { %3704 = vmatmul.mubr.msk.bf16.vlgmr.msra.gmra.mrb[12].mxu0 %vm433_vm1, %v5227_v63 }
 0x327   : > { %2361 = vmatprep.mubr.bf16.mxu0 %v5100_v19  ;;  %v2457_v13 = vpop.permute.xlu0 %2456 }
 0x328   : > { %3966 = vmatpush3.bf16.msra.mxu1 %v2949_v36 }
 0x329   : > { %3126 = vmatprep.subr.bf16.mxu1 %v3109_v33  ;;  %v3256_v39 = vpop.permute.xlu1 %3255 }
 0x32a   : > { %v3272_v49 = vsel %vm3271_vm8, %v3256_v39, %v3258_v30 }
 0x32b   : > { %3745 = vmatmul.mubr.msk.bf16.gmra.mrb[12].mxu1 %vm433_vm1, %v4295_v31  ;;  %v3270_v57 = vpop.permute.xlu0 %3269 }
 0x32c   : > { %3967 = vmatprep.mubr.msk.bf16.mxu1 %vm433_vm1, %v4294_v37 }
 0x32d   : > { %v3268_v63 = vpop.permute.xlu1 %3267 }
 0x32e   : > { %3705 = vmatmul.mubr.msk.bf16.gmra.mrb[16].mxu0 %vm433_vm1, %v5255_v28  ;;  %v3112_v28 = vsel %vm3107_vm0, %v5370_v20, %v5401_v21  ;;  %v3276_v58 = vsel %vm3271_vm8, %v3266_v9, %v3268_v63  ;;  %v3277_v51 = vsel %vm3271_vm8, %v3268_v63, %v3270_v57 }
 0x32f   : > { %2515 = vmatprep.mubr.bf16.mxu0 %v5100_v19 }
 0x331   : > { %v2451_v62 = vpop.permute.xlu1 %2450 }
 0x332   : > { %v2465_v0 = vsel %vm2464_vm2, %v2449_v42, %v2451_v62  ;;  %v2466_v10 = vsel %vm2464_vm2, %v2451_v62, %v5242_v17 }
 0x333   : > { %2483 = vmatprep.subr.bf16.mxu0 %v2466_v10  ;;  %3968 = vmatmul.mubr.msk.bf16.vlgmr.msra.gmra.mrb[4].mxu1 %vm433_vm1, %v4295_v31 }
 0x334   : > { %3127 = vmatpush1.bf16.msra.mxu1 %v3108_v11  ;;  %2484 = vmatpush1.bf16.msra.mxu0 %v2465_v0 }
 0x335   : > { %3128 = vmatprep.subr.bf16.mxu1 %v3112_v28  ;;  %v2459_v43 = vpop.permute.xlu1 %2458  ;;  %3158 = vmatprep.mubr.bf16.mxu1 %v5100_v19 }
 0x336   : > { %v2468_v17 = vsel %vm2464_vm2, %v2457_v13, %v2459_v43  ;;  %v2469_v3 = vsel %vm2464_vm2, %v2459_v43, %v5248_v24  ;;  %v3113_v24 = vsel %vm3107_vm0, %v5401_v21, %v5406_v35 }
 0x337   : > { %2485 = vmatprep.subr.bf16.mxu0 %v2469_v3 }
 0x338   : > { %3129 = vmatpush1.bf16.msra.mxu1 %v3111_v6  ;;  %2486 = vmatpush1.bf16.msra.mxu0 %v2468_v17 }
 0x339   : > { %3971 = vmatprep.subr.bf16.mxu1 %v3110_v53  ;;  %v3262_v59 = vpop.permute.xlu1 %3261 }
 0x33a   : > { %v3274_v61 = vsel %vm3271_vm8, %v5426_v34, %v3262_v59 }
 0x33b   : > { %3714 = vmatmul.mubr.msk.bf16.vlgmr.msra.gmra.mrb[12].mxu0 %vm433_vm1, %v5260_v29  ;;  %3754 = vmatmul.mubr.msk.bf16.vlgmr.msra.gmra.mrb[8].mxu1 %vm433_vm1, %v4296_v12  ;;  %v3273_v29 = vsel %vm3271_vm8, %v3258_v30, %v5426_v34  ;;  %v3480_v30 = vld [vmem:[%s4670_s25 + $0x20] sm:$0xff] }
 0x33c   : > { %3972 = vmatpush3.bf16.msra.mxu1 %v3110_v53  ;;  %2525 = vmatprep.mubr.bf16.mxu0 %v5100_v19  ;;  %v5518_v16 = vpop.permute.xlu0 %3415  ;;  %v3482_v53 = vld [vmem:[%s4670_s25 + $0x30] sm:$0xff] }
 0x33d   : > { %3973 = vmatprep.subr.bf16.mxu1 %v3113_v24  ;;  %3168 = vmatprep.mubr.bf16.mxu1 %v5100_v19 }
 0x340   : > { %3974 = vmatpush3.bf16.msra.mxu1 %v3113_v24  ;;  %v5522_v14 = vpop.permute.xlu0 %3425 }
 0x341   : > { %3290 = vmatprep.subr.bf16.mxu1 %v3273_v29 }
 0x343   : > { %3715 = vmatmul.mubr.msk.bf16.gmra.mrb[16].mxu0 %vm433_vm1, %v5286_v47  ;;  %3755 = vmatmul.mubr.msk.bf16.gmra.mrb[12].mxu1 %vm433_vm1, %v4297_v7  ;;  %v4298_v47 = vld [vmem:[%s5630_s4 + $0x80] sm:$0xff]  }
 0x344   : > { %3975 = vmatprep.mubr.msk.bf16.mxu1 %vm433_vm1, %v4296_v12  ;;  %v5532_v37 = vpop.permute.xlu0 %3451 }
 0x348   : > { %v3462_v59 = vpop.permute.xlu0 %3461 }
 0x34a   : > { %v5516_v5 = vpop.permute.xlu1 %3410 }
 0x34b   : > { %3976 = vmatmul.mubr.msk.bf16.vlgmr.msra.gmra.mrb[4].mxu1 %vm433_vm1, %v4297_v7 }
 0x34c   : > { %3291 = vmatpush1.bf16.msra.mxu1 %v3272_v49  ;;  %3322 = vmatprep.mubr.bf16.mxu1 %v5100_v19  ;;  %v3483_v49 = vld [vmem:[%s4670_s25 + $0x38] sm:$0xff] }
 0x34d   : > { %3292 = vmatprep.subr.bf16.mxu1 %v3276_v58 }
 0x34e   : > { %v5520_v8 = vpop.permute.xlu1 %3420 }
 0x350   : > { %3293 = vmatpush1.bf16.msra.mxu1 %v3275_v60 }
 0x351   : > { %3979 = vmatprep.subr.bf16.mxu1 %v3274_v61 }
 0x352   : > { %v5525_v4 = vpop.permute.xlu1 %3446 }
 0x353   : > { %3764 = vmatmul.mubr.msk.bf16.vlgmr.msra.gmra.mrb[8].mxu1 %vm433_vm1, %v4298_v47 }
 0x354   : > { %3980 = vmatpush3.bf16.msra.mxu1 %v3274_v61  ;;  %3332 = vmatprep.mubr.bf16.mxu1 %v5100_v19 }
 0x355   : > { %3981 = vmatprep.subr.bf16.mxu1 %v3277_v51 }
 0x356   : > { %v3457_v6 = vpop.permute.xlu1 %3456 }
 0x358   : > { %3982 = vmatpush3.bf16.msra.mxu1 %v3277_v51 }
 0x35b   : > { %3765 = vmatmul.mubr.msk.bf16.gmra.mrb[12].mxu1 %vm433_vm1, %v4299_v26 }
 0x35c   : > { %3983 = vmatprep.mubr.msk.bf16.mxu1 %vm433_vm1, %v4298_v47  ;;  %v3485_v47 = vld [vmem:[%s4670_s25 + $0x48] sm:$0xff] }
 0x363   : > { %3984 = vmatmul.mubr.msk.bf16.vlgmr.msra.gmra.mrb[4].mxu1 %vm433_vm1, %v4299_v26  ;;  %v3486_v26 = vld [vmem:[%s4670_s25 + $0x50] sm:$0xff] }
 0x40e   : > { %v2517_v32 = vpop.f32.mrb[12].mxu0 }
 0x40f   : > { %v2519_v55 = vpop.f32.mrb[13].mxu0 }
 0x410   : > { %v2521_v20 = vpop.f32.mrb[14].mxu0 }
 0x411   : > { %v2523_v52 = vpop.f32.mrb[15].mxu0 }
 0x416   : > { %v2527_v56 = vpop.f32.mrb[16].mxu0 }
 0x417   : > { %v2529_v45 = vpop.f32.mrb[17].mxu0 }
 0x418   : > { %v2531_v19 = vpop.f32.mrb[18].mxu0 }
 0x419   : > { %v2533_v1 = vpop.f32.mrb[19].mxu0 }
 0x426   : > { %v3324_v38 = vpop.f32.mrb[8].mxu1 }
 0x427   : > { %v3991_v22 = vadd.f32 %v3324_v38, %v2517_v32  ;;  %v3326_v23 = vpop.f32.mrb[9].mxu1 }
 0x428   : > { %v3992_v27 = vadd.f32 %v3326_v23, %v2519_v55  ;;  %v3328_v21 = vpop.f32.mrb[10].mxu1 }
 0x429   : > { %v3428_v35 = vmul.f32 %v3991_v22, %v5516_v5  ;;  %v3993_v25 = vadd.f32 %v3328_v21, %v2521_v20  ;;  %v3330_v46 = vpop.f32.mrb[11].mxu1  ;;  %v3484_v22 = vld [vmem:[%s4670_s25 + $0x40] sm:$0xff] }
 0x42a   : > { %v3429_v44 = vmul.f32 %v3992_v27, %v5516_v5  ;;  %v3994_v48 = vadd.f32 %v3330_v46, %v2523_v52 }
 0x42b   : > { %v3464_v50 = vadd.f32 %v5525_v4, %v3428_v35  ;;  %v3431_v34 = vmul.f32 %v3993_v25, %v5518_v16  ;;  %v3478_v25 = vld [vmem:[%s4670_s25 + $0x10] sm:$0xff] }
 0x42c   : > { %v3465_v2 = vadd.f32 %v5525_v4, %v3429_v44  ;;  %v3432_v54 = vmul.f32 %v3994_v48, %v5518_v16  ;;  %v3487_v48 = vld [vmem:[%s4670_s25 + $0x58] sm:$0xff] }
 0x42d   : > { %v3488_v36 = vadd.f32 %v3476_v15, %v3464_v50  ;;  %v3467_v41 = vadd.f32 %v5532_v37, %v3431_v34  ;;  %v3481_v34 = vld [vmem:[%s4670_s25 + $0x28] sm:$0xff]  ;;  %s5576_s25 = scalar_lea.hbm %s5634_s8, %s4182_s26 }
 0x42e   : > { %v3489_v31 = vadd.f32 %v3477_v18, %v3465_v2  ;;  %v3468_v33 = vadd.f32 %v5532_v37, %v3432_v54  ;;  %v3334_v39 = vpop.f32.mrb[12].mxu1 }
 0x42f   : > { %v3500_v9 = vmax.f32 %v3488_v36, 0.0  ;;  %v3491_v63 = vadd.f32 %v3479_v40, %v3467_v41  ;;  %v3995_v42 = vadd.f32 %v3334_v39, %v2527_v56  ;;  %v3336_v62 = vpop.f32.mrb[13].mxu1 }
 0x430   : > { %v3501_v0 = vmax.f32 %v3489_v31, 0.0  ;;  %v3492_v10 = vadd.f32 %v3480_v30, %v3468_v33  ;;  %v3996_v11 = vadd.f32 %v3336_v62, %v2529_v45  ;;  %v3338_v28 = vpop.f32.mrb[14].mxu1 }
 0x431   : > { %3512 = vst [vmem:[%s5542_s17] sm:$0xff] %v3500_v9  ;;  %v3503_v13 = vmax.f32 %v3491_v63, 0.0  ;;  %v3434_v43 = vmul.f32 %v3995_v42, %v5520_v8  ;;  %v3997_v17 = vadd.f32 %v3338_v28, %v2531_v19  ;;  %v3340_v3 = vpop.f32.mrb[15].mxu1 }
 0x432   : > { %3513 = vst [vmem:[%s5542_s17 + $0x8] sm:$0xff] %v3501_v0  ;;  %v3504_v12 = vmax.f32 %v3492_v10, 0.0  ;;  %v3435_v24 = vmul.f32 %v3996_v11, %v5520_v8  ;;  %v3998_v7 = vadd.f32 %v3340_v3, %v2533_v1 }
 0x433   : > { %3515 = vst [vmem:[%s5542_s17 + $0x18] sm:$0xff] %v3503_v13  ;;  %v3470_v29 = vadd.f32 %v3457_v6, %v3434_v43  ;;  %v3437_v58 = vmul.f32 %v3997_v17, %v5522_v14 }
 0x434   : > { %3516 = vst [vmem:[%s5542_s17 + $0x20] sm:$0xff] %v3504_v12  ;;  %v3471_v60 = vadd.f32 %v3457_v6, %v3435_v24  ;;  %v3438_v61 = vmul.f32 %v3998_v7, %v5522_v14 }
 0x435   : > { %v3494_v57 = vadd.f32 %v3482_v53, %v3470_v29  ;;  %v3473_v51 = vadd.f32 %v3462_v59, %v3437_v58 }
 0x436   : > { %v3495_v32 = vadd.f32 %v3483_v49, %v3471_v60  ;;  %v3474_v55 = vadd.f32 %v3462_v59, %v3438_v61  ;;  %v3985_v20 = vpop.f32.mrb[4].mxu1 }
 0x437   : > { %v3506_v52 = vmax.f32 %v3494_v57, 0.0  ;;  %v3497_v56 = vadd.f32 %v3485_v47, %v3473_v51  ;;  %v3436_v45 = vmul.f32 %v3985_v20, %v5520_v8  ;;  %v3377_v19 = vpop.f32.mrb[5].mxu1 }
 0x438   : > { %v3507_v1 = vmax.f32 %v3495_v32, 0.0  ;;  %v3498_v38 = vadd.f32 %v3486_v26, %v3474_v55  ;;  %v3430_v23 = vmul.f32 %v5516_v5, %v3377_v19  ;;  %v3986_v27 = vpop.f32.mrb[6].mxu1 }
 0x439   : > { %3518 = vst [vmem:[%s5542_s17 + $0x30] sm:$0xff] %v3506_v52  ;;  %v3509_v21 = vmax.f32 %v3497_v56, 0.0  ;;  %v3472_v35 = vadd.f32 %v3457_v6, %v3436_v45  ;;  %v3439_v46 = vmul.f32 %v3986_v27, %v5522_v14  ;;  %v3380_v15 = vpop.f32.mrb[7].mxu1 }
 0x43a   : > { %3519 = vst [vmem:[%s5542_s17 + $0x38] sm:$0xff] %v3507_v1  ;;  %v3510_v8 = vmax.f32 %v3498_v38, 0.0  ;;  %v3466_v44 = vadd.f32 %v5525_v4, %v3430_v23  ;;  %v3433_v5 = vmul.f32 %v5518_v16, %v3380_v15 }
 0x43b   : > { %3521 = vst [vmem:[%s5542_s17 + $0x48] sm:$0xff] %v3509_v21  ;;  %v3496_v50 = vadd.f32 %v3484_v22, %v3472_v35  ;;  %v3475_v18 = vadd.f32 %v3462_v59, %v3439_v46 }
 0x43c   : > { %3522 = vst [vmem:[%s5542_s17 + $0x50] sm:$0xff] %v3510_v8  ;;  %v3490_v14 = vadd.f32 %v3478_v25, %v3466_v44  ;;  %v3469_v2 = vadd.f32 %v5532_v37, %v3433_v5 }
 0x43d   : > { %v3508_v40 = vmax.f32 %v3496_v50, 0.0  ;;  %v3499_v4 = vadd.f32 %v3487_v48, %v3475_v18 }
 0x43e   : > { %v3502_v54 = vmax.f32 %v3490_v14, 0.0  ;;  %v3493_v36 = vadd.f32 %v3481_v34, %v3469_v2 }
 0x43f   : > { %3520 = vst [vmem:[%s5542_s17 + $0x40] sm:$0xff] %v3508_v40  ;;  %v3511_v16 = vmax.f32 %v3499_v4, 0.0 }
 0x440   : > { %3514 = vst [vmem:[%s5542_s17 + $0x10] sm:$0xff] %v3502_v54  ;;  %v3505_v41 = vmax.f32 %v3493_v36, 0.0 }
 0x441   : > { %3523 = vst [vmem:[%s5542_s17 + $0x58] sm:$0xff] %v3511_v16 }
 0x442   : > { %3517 = vst [vmem:[%s5542_s17 + $0x28] sm:$0xff] %v3505_v41 }
 0x443   : > { %4396 = shalt.err (!%p4393_p7)
}
 0x444   : > { %s4397_s21 = scalar_lea.hbm %s5576_s25, 1536  ;;  %s4401_s17 = scalar_lea.hbm %s5634_s8, 3072 }
 0x445   : > { %p4398_p9 = scmp.ne.s32.totalorder %s5576_s25, %s4397_s21  ;;  %p4402_p5 = scmp.lt.u32.totalorder %s5576_s25, %s5634_s8 }
 0x446   : > { %p4403_p11 = scmp.lt.u32.totalorder %s4401_s17, %s4397_s21  ;;  %p4405_p4 = scmp.lt.u32.totalorder %s4397_s21, %s5576_s25 }
 0x447   : > { %p4399_p2 = pnand %p4398_p9, %p4616_p12 }
 0x448   : > { %p4404_p1 = por %p4403_p11, %p4402_p5 }
 0x449   : > { %p4400_p0 = pneg %p4399_p2 }
 0x44a   : > { %p4406_p6 = por %p4405_p4, %p4404_p1 }
 0x44c   : > { %p4407_p8 = pnand %p4406_p6, %p4400_p0 }
 0x44e   : > { %4410 = shalt.err (!%p4407_p8)
}
 0x44f   : > { %s4479_s15 = smov 384  }
 0x450   : > { %4189 = dma.vmem_to_hbm [thread:$0]  (%p4616_p12), %s5579_s16, 1536, %s5576_s25, %s3525_s9, %s4479_s15, %s4479_s15, %s4462_s13  }
 0x451 PF: > { %s3553_s19 = sand.u32 1, %s4441_s27   ;;  %p5654_p10 = scmp.ne.s32.totalorder %s5642_s12, 0 }
 0x452   : > { %p5655_p13 = scmp.ge.s32.totalorder %s4453_s30, 2  ;;  %s3554_s20 = scalar_lea.sflag [#allocation5], %s3553_s19 }
 0x454   : > { %p4200_p3 = pnand %p5655_p13, %p5654_p10 }
 0x456   : > { %4436 = dma.done.wait (!%p4200_p3), %s3554_s20, 1536  }
 0x457   : > { %4438 = vsyncadd (!%p4200_p3), %s3554_s20, 4294965760  ;;  %s5656_s30 = sld [smem:[#allocation12_spill]]  ;;  %s5657_s27 = smov %s4445_s28 }
 0x458   : > { %s5658_s28 = smov %s4449_s29  ;;  %s5659_s29 = smov %s4612_s23 }
 0x45d   : > { %p22_p7 = scmp.ge.s32.totalorder %s5656_s30, 4  }
 0x45f   :  { %24 = sbr.rel (!%p22_p7) target bundleno = 8 (0x8), region = 117 }
 0x466   :  { %3559 = vsyncpa [#allocation4], 1 }
 0x467   :  { %3561 = vsyncpa [#allocation4 + $0x1], 1 }
 0x468   :  { %3562 = vsyncpa [#allocation7], 1 }
 0x469   :  { %3563 = vsyncpa [#allocation5], 1 }
 0x46a   :  { %3565 = vsyncpa [#allocation5 + $0x1], 1 }

</bundles_post_ra>
